<compile_context>
chip_gen: v6e
topology: v6e:2x2x1
jax: 0.10.0
libtpu: 0.0.40
codegen_flags: <defaults>
</compile_context>

<pallas_src>
import functools

import numpy as np
import jax
import jax.numpy as jnp
from jax.experimental import pallas as pl
from jax.experimental.pallas import tpu as pltpu

# bf16 matmul operands (f32 accumulation); set to jnp.float32 for exact-f32 runs.
MXU_DTYPE = jnp.bfloat16


# -----------------------------------------------------------------------------
# helpers
# -----------------------------------------------------------------------------
def _round_up(x, m):
    return (x + m - 1) // m * m


def _apply_act(x, act):
    if act == "leaky":            # F.leaky_relu(..., negative_slope=0.2)
        return jnp.where(x >= 0, x, 0.2 * x)
    if act == "sigmoid":
        return jax.nn.sigmoid(x)
    return x


# -----------------------------------------------------------------------------
# Pallas matmul kernel: grid-tiled over M, fused activation, f32 accumulation
# -----------------------------------------------------------------------------
def _mm_kernel_factory(act):
    def kernel(a_ref, b_ref, o_ref):
        acc = jnp.dot(a_ref[...], b_ref[...], preferred_element_type=jnp.float32)
        o_ref[...] = _apply_act(acc, act).astype(o_ref.dtype)
    return kernel


def pallas_matmul(a, b, act="none", out_dtype=jnp.float32, tm=256):
    """(M, K) @ (K, N) with fused activation; tiled over M with a 'parallel' grid."""
    M, K = a.shape
    K2, N = b.shape
    assert K == K2
    # tm=256 keeps the double-buffered working set far under v7x's 64 MiB VMEM
    # while still being a full block for all the small shapes in this model.
    tm_eff = min(tm, _round_up(M, 8))
    Mp = _round_up(M, tm_eff)
    if Mp != M:
        a = jnp.pad(a, ((0, Mp - M), (0, 0)))
    grid = (Mp // tm_eff,)
    out_itemsize = np.dtype(out_dtype).itemsize
    out = pl.pallas_call(
        _mm_kernel_factory(act),
        out_shape=jax.ShapeDtypeStruct((Mp, N), out_dtype),
        grid=grid,
        in_specs=[
            pl.BlockSpec((tm_eff, K), lambda i: (i, 0)),
            pl.BlockSpec((K, N), lambda i: (0, 0)),
        ],
        out_specs=pl.BlockSpec((tm_eff, N), lambda i: (i, 0)),
        compiler_params=pltpu.CompilerParams(
            dimension_semantics=("parallel",),
            vmem_limit_bytes=32 * 1024 * 1024,
        ),
        cost_estimate=pl.CostEstimate(
            flops=2 * Mp * K * N,
            transcendentals=0,
            bytes_accessed=int(Mp * K * a.dtype.itemsize
                               + K * N * b.dtype.itemsize
                               + Mp * N * out_itemsize),
        ),
    )(a, b)
    return out[:M] if Mp != M else out


# -----------------------------------------------------------------------------
# Fused latent-path kernel:
#   heads = hz @ [mu_w | var_w]           (one MXU pass for both heads)
#   z     = mu + eps * exp(0.5 * log_var)
#   zd    = leaky_relu(z @ dec_lin_w)
#   logits= z @ cls_w + cls_b
# hz and z stay resident in VMEM; 4 outputs written from one pallas_call.
# -----------------------------------------------------------------------------
def _latent_kernel(hz_ref, wheads_ref, eps_ref, wdec_ref, wcls_ref, bcls_ref,
                   mu_ref, lv_ref, zd_ref, logits_ref):
    L = mu_ref.shape[1]
    heads = jnp.dot(hz_ref[...], wheads_ref[...],
                    preferred_element_type=jnp.float32)          # (B, 2L) f32
    mu = heads[:, :L]
    lv = heads[:, L:2 * L]
    mu_ref[...] = mu
    lv_ref[...] = lv
    z = mu + eps_ref[...] * jnp.exp(0.5 * lv)                    # f32 reparam
    zb = z.astype(wdec_ref.dtype)
    zd = jnp.dot(zb, wdec_ref[...], preferred_element_type=jnp.float32)
    zd_ref[...] = jnp.where(zd >= 0, zd, 0.2 * zd).astype(zd_ref.dtype)
    logits = jnp.dot(zb, wcls_ref[...], preferred_element_type=jnp.float32)
    logits_ref[...] = (logits + bcls_ref[...]).astype(logits_ref.dtype)


def fused_latent(hz, w_heads, eps, w_dec, w_cls, b_cls):
    B, F = hz.shape
    L = eps.shape[1]
    C = w_cls.shape[1]

    def full(shape):
        return pl.BlockSpec(shape, lambda: (0,) * len(shape))

    return pl.pallas_call(
        _latent_kernel,
        out_shape=(
            jax.ShapeDtypeStruct((B, L), jnp.float32),      # mu
            jax.ShapeDtypeStruct((B, L), jnp.float32),      # log_var
            jax.ShapeDtypeStruct((B, F), MXU_DTYPE),        # zd (decoder input)
            jax.ShapeDtypeStruct((B, C), jnp.float32),      # class logits
        ),
        in_specs=[full((B, F)), full((F, 2 * L)), full((B, L)),
                  full((L, F)), full((L, C)), full((1, C))],
        out_specs=(full((B, L)), full((B, L)), full((B, F)), full((B, C))),
        compiler_params=pltpu.CompilerParams(vmem_limit_bytes=32 * 1024 * 1024),
        cost_estimate=pl.CostEstimate(
            flops=2 * B * F * 2 * L + 2 * B * L * F + 2 * B * L * C,
            transcendentals=B * L,
            bytes_accessed=int(2 * (F * 2 * L + L * F + L * C)
                               + 4 * B * (F + 4 * L + 2 * C)),
        ),
    )(hz, w_heads, eps, w_dec, w_cls, b_cls)


# -----------------------------------------------------------------------------
# NHWC conv / transposed-conv built on the Pallas matmul
# -----------------------------------------------------------------------------
def _im2col_nhwc(x, k, stride, padding):
    """x: (B, H, W, C) -> patches (B*OH*OW, k*k*C) in (kh, kw, C) order."""
    B, H, W, C = x.shape
    if padding:
        x = jnp.pad(x, ((0, 0), (padding, padding), (padding, padding), (0, 0)))
    Hp, Wp = x.shape[1], x.shape[2]
    OH = (Hp - k) // stride + 1
    OW = (Wp - k) // stride + 1
    cols = []
    for i in range(k):
        for j in range(k):
            cols.append(x[:, i:i + (OH - 1) * stride + 1:stride,
                          j:j + (OW - 1) * stride + 1:stride, :])  # (B,OH,OW,C)
    patches = jnp.stack(cols, axis=3)                  # (B, OH, OW, k*k, C)
    return patches.reshape(B * OH * OW, k * k * C), (B, OH, OW)


def conv2d_nhwc(x, w_mat, k, stride, padding, act, out_dtype):
    """x: (B,H,W,Cin); w_mat: (k*k*Cin, Cout) in (kh, kw, Cin) row order."""
    A, (B, OH, OW) = _im2col_nhwc(x, k, stride, padding)
    Cout = w_mat.shape[1]
    out = pallas_matmul(A.astype(w_mat.dtype), w_mat, act=act, out_dtype=out_dtype)
    return out.reshape(B, OH, OW, Cout)


def pack_deconv_weight(w):
    """PyTorch ConvTranspose2d weight (Cin, Cout, 4, 4), stride=2, pad=1 ->
    packed (9*Cin, 4*Cout) sub-pixel weight for a 3x3/stride-1/pad-1 conv whose
    N axis holds the 4 output phases (ordered phase = 2*r + c)."""
    Cin, Cout = w.shape[0], w.shape[1]
    # (phase_parity, window_offset) -> original 4-tap index (None = zero tap)
    tap = {(0, 0): 3, (0, 1): 1, (1, 1): 2, (1, 2): 0}
    Wp = jnp.zeros((3, 3, Cin, 4, Cout), w.dtype)
    for r in range(2):
        for c in range(2):
            for a in range(3):
                for b in range(3):
                    ta = tap.get((r, a))
                    tb = tap.get((c, b))
                    if ta is None or tb is None:
                        continue
                    Wp = Wp.at[a, b, :, 2 * r + c, :].set(w[:, :, ta, tb])
    return Wp.reshape(9 * Cin, 4 * Cout)


def conv_transpose2d_nhwc_s2(x, w_packed, cout, act, out_dtype):
    """ConvTranspose2d(k=4, stride=2, pad=1) via sub-pixel phase decomposition."""
    B, H, W, Cin = x.shape
    A, _ = _im2col_nhwc(x, k=3, stride=1, padding=1)          # (B*H*W, 9*Cin)
    out = pallas_matmul(A.astype(w_packed.dtype), w_packed, act=act,
                        out_dtype=out_dtype)                   # (B*H*W, 4*Cout)
    out = out.reshape(B, H, W, 2, 2, cout)                     # (..., r, c, Cout)
    out = out.transpose(0, 1, 3, 2, 4, 5).reshape(B, 2 * H, 2 * W, cout)
    return out


# -----------------------------------------------------------------------------
# VAE forward
# -----------------------------------------------------------------------------
def vae_forward(params, x_nchw, eps, dec_channels):
    B, in_ch = x_nchw.shape[0], x_nchw.shape[1]
    flat = dec_channels * 8 * 4 * 4

    # --- encoder (synthetic MTL_Encoder): 16x16 -> 8x8 -> 4x4, NHWC ---
    x = jnp.transpose(x_nchw, (0, 2, 3, 1)).astype(MXU_DTYPE)
    h = conv2d_nhwc(x, params["enc_w1"], k=4, stride=2, padding=1,
                    act="leaky", out_dtype=MXU_DTYPE)
    h = conv2d_nhwc(h, params["enc_w2"], k=4, stride=2, padding=1,
                    act="leaky", out_dtype=MXU_DTYPE)
    hz = h.reshape(B, flat)                       # NHWC flatten (see header note)

    # --- fused latent path: heads + reparameterize + dec_lin + classifier ---
    mu, log_var, zd, class_logits = fused_latent(
        hz, params["heads_w"], eps, params["dec_lin_w"],
        params["cls_w"], params["cls_b"])

    # --- decoder (synthetic): 4x4 -> 8x8 -> 16x16, sub-pixel transposed convs ---
    zimg = zd.reshape(B, 4, 4, dec_channels * 8)
    d = conv_transpose2d_nhwc_s2(zimg, params["dec_w1"], dec_channels,
                                 act="leaky", out_dtype=MXU_DTYPE)
    recon_nhwc = conv_transpose2d_nhwc_s2(d, params["dec_w2"], in_ch,
                                          act="sigmoid", out_dtype=jnp.float32)
    recon = jnp.transpose(recon_nhwc, (0, 3, 1, 2))    # back to NCHW

    return mu, log_var, recon, class_logits


# -----------------------------------------------------------------------------
# Deterministic parameter init (shapes implied by VAE.__init__)
# -----------------------------------------------------------------------------
def init_params(key, latent_size, num_classes, in_channels, dec_channels):
    ks = jax.random.split(key, 9)
    flat = dec_channels * 8 * 4 * 4

    def w(k, shape, fan_in, dtype=MXU_DTYPE):
        return (jax.random.normal(k, shape, jnp.float32)
                / jnp.sqrt(fan_in)).astype(dtype)

    mu_w = w(ks[2], (flat, latent_size), flat)
    var_w = w(ks[3], (flat, latent_size), flat)
    # transposed-conv weights in PyTorch (Cin, Cout, k, k) layout, phase-packed
    dec_w1 = w(ks[5], (dec_channels * 8, dec_channels, 4, 4), dec_channels * 8 * 16)
    dec_w2 = w(ks[6], (dec_channels, in_channels, 4, 4), dec_channels * 16)

    return {
        # encoder conv weights already in matmul form (kh*kw*Cin, Cout)
        "enc_w1": w(ks[0], (4 * 4 * in_channels, dec_channels), in_channels * 16),
        "enc_w2": w(ks[1], (4 * 4 * dec_channels, dec_channels * 8), dec_channels * 16),
        # mu/var heads packed along N (bias=False)
        "heads_w": jnp.concatenate([mu_w, var_w], axis=1),
        "dec_lin_w": w(ks[4], (latent_size, flat), latent_size),
        "dec_w1": pack_deconv_weight(dec_w1),
        "dec_w2": pack_deconv_weight(dec_w2),
        # classifier (nn.Linear default bias=True)
        "cls_w": w(ks[7], (latent_size, num_classes), latent_size),
        "cls_b": jnp.zeros((1, num_classes), jnp.float32),
    }


if __name__ == "__main__":
    B, IN_CH, HW = 2, 3, 16
    DEC_CHANNELS = 8
    LATENT = 16
    NUM_CLASSES = 10

    key = jax.random.PRNGKey(0)
    k_param, k_x, k_eps = jax.random.split(key, 3)

    params = init_params(k_param, LATENT, NUM_CLASSES, IN_CH, DEC_CHANNELS)
    x = jax.random.normal(k_x, (B, IN_CH, HW, HW), jnp.float32)
    eps = jax.random.normal(k_eps, (B, LATENT), jnp.float32)  # torch.randn_like(std)

    fwd = jax.jit(functools.partial(vae_forward, dec_channels=DEC_CHANNELS))
    mu, log_var, recon, logits = fwd(params, x, eps)
    jax.block_until_ready((mu, log_var, recon, logits))

    assert mu.shape == (B, LATENT)
    assert log_var.shape == (B, LATENT)
    assert recon.shape == (B, IN_CH, HW, HW)
    assert logits.shape == (B, NUM_CLASSES)
    assert all(bool(jnp.all(jnp.isfinite(t))) for t in (mu, log_var, recon, logits))
    print("KERNEL_OK")
</pallas_src>

<mosaic_0001>
module attributes {stable_mosaic.version = 11 : i64} {
  func.func @kernel(%arg0: i32, %arg1: memref<128x48xbf16, #tpu.memory_space<vmem>>, %arg2: memref<48x8xbf16, #tpu.memory_space<vmem>>, %arg3: memref<128x8xbf16, #tpu.memory_space<vmem>>) attributes {dimension_semantics = [#tpu.dimension_semantics<parallel>], iteration_bounds = array<i64: 1>, scalar_prefetch = 0 : i64, scratch_operands = 0 : i64, tpu.core_type = #tpu.core_type<tc>, window_params = [{transform_indices = @transform_0, window_bounds = array<i64: 128, 48>}, {pipeline_mode = #tpu.pipeline_mode<synchronous>, transform_indices = @transform_1, window_bounds = array<i64: 48, 8>}, {transform_indices = @transform_2, window_bounds = array<i64: 128, 8>}]} {
    %c0 = arith.constant 0 : index
    %c0_0 = arith.constant 0 : index
    %0 = vector.load %arg1[%c0, %c0_0] : memref<128x48xbf16, #tpu.memory_space<vmem>>, vector<128x48xbf16>
    %c0_1 = arith.constant 0 : index
    %c0_2 = arith.constant 0 : index
    %1 = vector.load %arg2[%c0_1, %c0_2] : memref<48x8xbf16, #tpu.memory_space<vmem>>, vector<48x8xbf16>
    %cst = arith.constant dense<0.000000e+00> : vector<128x8xf32>
    %2 = tpu.matmul %0, %1, %cst {dimension_numbers = #tpu.dot_dimension_numbers<[1], [0], [0], [1], [0, 0, 1, 1], [], []>} : vector<128x48xbf16>, vector<48x8xbf16>, vector<128x8xf32> -> vector<128x8xf32>
    %cst_3 = arith.constant 0.000000e+00 : f32
    %3 = vector.broadcast %cst_3 : f32 to vector<128x8xf32>
    %4 = arith.cmpf oge, %2, %3 : vector<128x8xf32>
    %cst_4 = arith.constant 2.000000e-01 : f32
    %5 = vector.broadcast %cst_4 : f32 to vector<128x8xf32>
    %6 = arith.mulf %5, %2 : vector<128x8xf32>
    %7 = arith.select %4, %2, %6 : vector<128x8xi1>, vector<128x8xf32>
    %8 = arith.truncf %7 : vector<128x8xf32> to vector<128x8xbf16>
    %c0_5 = arith.constant 0 : index
    %c0_6 = arith.constant 0 : index
    %9 = vector.load %arg3[%c0_5, %c0_6] : memref<128x8xbf16, #tpu.memory_space<vmem>>, vector<128x8xbf16>
    tpu.vector_store %arg3[%c0_5, %c0_6], %8 {strides = array<i32>} : memref<128x8xbf16, #tpu.memory_space<vmem>>, vector<128x8xbf16>,
    return
  }
  func.func @transform_0(%arg0: i32) -> (i32, i32) {
    %c0_i32 = arith.constant 0 : i32
    %c0_i32_0 = arith.constant 0 : i32
    return %arg0, %c0_i32 : i32, i32
  }
  func.func @transform_1(%arg0: i32) -> (i32, i32) {
    %c0_i32 = arith.constant 0 : i32
    %c0_i32_0 = arith.constant 0 : i32
    %c0_i32_1 = arith.constant 0 : i32
    return %c0_i32, %c0_i32_0 : i32, i32
  }
  func.func @transform_2(%arg0: i32) -> (i32, i32) {
    %c0_i32 = arith.constant 0 : i32
    %c0_i32_0 = arith.constant 0 : i32
    return %arg0, %c0_i32 : i32, i32
  }
}

module attributes {stable_mosaic.version = 11 : i64} {
  func.func @kernel(%arg0: i32, %arg1: memref<32x128xbf16, #tpu.memory_space<vmem>>, %arg2: memref<128x64xbf16, #tpu.memory_space<vmem>>, %arg3: memref<32x64xbf16, #tpu.memory_space<vmem>>) attributes {dimension_semantics = [#tpu.dimension_semantics<parallel>], iteration_bounds = array<i64: 1>, scalar_prefetch = 0 : i64, scratch_operands = 0 : i64, tpu.core_type = #tpu.core_type<tc>, window_params = [{transform_indices = @transform_0, window_bounds = array<i64: 32, 128>}, {pipeline_mode = #tpu.pipeline_mode<synchronous>, transform_indices = @transform_1, window_bounds = array<i64: 128, 64>}, {transform_indices = @transform_2, window_bounds = array<i64: 32, 64>}]} {
    %c0 = arith.constant 0 : index
    %c0_0 = arith.constant 0 : index
    %0 = vector.load %arg1[%c0, %c0_0] : memref<32x128xbf16, #tpu.memory_space<vmem>>, vector<32x128xbf16>
    %c0_1 = arith.constant 0 : index
    %c0_2 = arith.constant 0 : index
    %1 = vector.load %arg2[%c0_1, %c0_2] : memref<128x64xbf16, #tpu.memory_space<vmem>>, vector<128x64xbf16>
    %cst = arith.constant dense<0.000000e+00> : vector<32x64xf32>
    %2 = tpu.matmul %0, %1, %cst {dimension_numbers = #tpu.dot_dimension_numbers<[1], [0], [0], [1], [0, 0, 1, 1], [], []>} : vector<32x128xbf16>, vector<128x64xbf16>, vector<32x64xf32> -> vector<32x64xf32>
    %cst_3 = arith.constant 0.000000e+00 : f32
    %3 = vector.broadcast %cst_3 : f32 to vector<32x64xf32>
    %4 = arith.cmpf oge, %2, %3 : vector<32x64xf32>
    %cst_4 = arith.constant 2.000000e-01 : f32
    %5 = vector.broadcast %cst_4 : f32 to vector<32x64xf32>
    %6 = arith.mulf %5, %2 : vector<32x64xf32>
    %7 = arith.select %4, %2, %6 : vector<32x64xi1>, vector<32x64xf32>
    %8 = arith.truncf %7 : vector<32x64xf32> to vector<32x64xbf16>
    %c0_5 = arith.constant 0 : index
    %c0_6 = arith.constant 0 : index
    %9 = vector.load %arg3[%c0_5, %c0_6] : memref<32x64xbf16, #tpu.memory_space<vmem>>, vector<32x64xbf16>
    tpu.vector_store %arg3[%c0_5, %c0_6], %8 {strides = array<i32>} : memref<32x64xbf16, #tpu.memory_space<vmem>>, vector<32x64xbf16>,
    return
  }
  func.func @transform_0(%arg0: i32) -> (i32, i32) {
    %c0_i32 = arith.constant 0 : i32
    %c0_i32_0 = arith.constant 0 : i32
    return %arg0, %c0_i32 : i32, i32
  }
  func.func @transform_1(%arg0: i32) -> (i32, i32) {
    %c0_i32 = arith.constant 0 : i32
    %c0_i32_0 = arith.constant 0 : i32
    %c0_i32_1 = arith.constant 0 : i32
    return %c0_i32, %c0_i32_0 : i32, i32
  }
  func.func @transform_2(%arg0: i32) -> (i32, i32) {
    %c0_i32 = arith.constant 0 : i32
    %c0_i32_0 = arith.constant 0 : i32
    return %arg0, %c0_i32 : i32, i32
  }
}

module attributes {stable_mosaic.version = 11 : i64} {
  func.func @_latent_kernel(%arg0: memref<2x1024xbf16, #tpu.memory_space<vmem>>, %arg1: memref<1024x32xbf16, #tpu.memory_space<vmem>>, %arg2: memref<2x16xf32, #tpu.memory_space<vmem>>, %arg3: memref<16x1024xbf16, #tpu.memory_space<vmem>>, %arg4: memref<16x10xbf16, #tpu.memory_space<vmem>>, %arg5: memref<1x10xf32, #tpu.memory_space<vmem>>, %arg6: memref<2x16xf32, #tpu.memory_space<vmem>>, %arg7: memref<2x16xf32, #tpu.memory_space<vmem>>, %arg8: memref<2x1024xbf16, #tpu.memory_space<vmem>>, %arg9: memref<2x10xf32, #tpu.memory_space<vmem>>) attributes {dimension_semantics = [], scalar_prefetch = 0 : i64, scratch_operands = 0 : i64, tpu.core_type = #tpu.core_type<tc>} {
    %c0 = arith.constant 0 : index
    %c0_0 = arith.constant 0 : index
    %0 = vector.load %arg0[%c0, %c0_0] : memref<2x1024xbf16, #tpu.memory_space<vmem>>, vector<2x1024xbf16>
    %c0_1 = arith.constant 0 : index
    %c0_2 = arith.constant 0 : index
    %1 = vector.load %arg1[%c0_1, %c0_2] : memref<1024x32xbf16, #tpu.memory_space<vmem>>, vector<1024x32xbf16>
    %cst = arith.constant dense<0.000000e+00> : vector<2x32xf32>
    %2 = tpu.matmul %0, %1, %cst {dimension_numbers = #tpu.dot_dimension_numbers<[1], [0], [0], [1], [0, 0, 1, 1], [], []>} : vector<2x1024xbf16>, vector<1024x32xbf16>, vector<2x32xf32> -> vector<2x32xf32>
    %3 = vector.extract_strided_slice %2 {offsets = [0, 0], sizes = [2, 16], strides = [1, 1]} : vector<2x32xf32> to vector<2x16xf32>
    %4 = vector.extract_strided_slice %2 {offsets = [0, 16], sizes = [2, 16], strides = [1, 1]} : vector<2x32xf32> to vector<2x16xf32>
    %c0_3 = arith.constant 0 : index
    %c0_4 = arith.constant 0 : index
    %5 = vector.load %arg6[%c0_3, %c0_4] : memref<2x16xf32, #tpu.memory_space<vmem>>, vector<2x16xf32>
    tpu.vector_store %arg6[%c0_3, %c0_4], %3 {strides = array<i32>} : memref<2x16xf32, #tpu.memory_space<vmem>>, vector<2x16xf32>,
    %c0_5 = arith.constant 0 : index
    %c0_6 = arith.constant 0 : index
    %6 = vector.load %arg7[%c0_5, %c0_6] : memref<2x16xf32, #tpu.memory_space<vmem>>, vector<2x16xf32>
    tpu.vector_store %arg7[%c0_5, %c0_6], %4 {strides = array<i32>} : memref<2x16xf32, #tpu.memory_space<vmem>>, vector<2x16xf32>,
    %c0_7 = arith.constant 0 : index
    %c0_8 = arith.constant 0 : index
    %7 = vector.load %arg2[%c0_7, %c0_8] : memref<2x16xf32, #tpu.memory_space<vmem>>, vector<2x16xf32>
    %cst_9 = arith.constant 5.000000e-01 : f32
    %8 = vector.broadcast %cst_9 : f32 to vector<2x16xf32>
    %9 = arith.mulf %8, %4 : vector<2x16xf32>
    %10 = math.exp %9 : vector<2x16xf32>
    %11 = arith.mulf %7, %10 : vector<2x16xf32>
    %12 = arith.addf %3, %11 : vector<2x16xf32>
    %13 = arith.truncf %12 : vector<2x16xf32> to vector<2x16xbf16>
    %c0_10 = arith.constant 0 : index
    %c0_11 = arith.constant 0 : index
    %14 = vector.load %arg3[%c0_10, %c0_11] : memref<16x1024xbf16, #tpu.memory_space<vmem>>, vector<16x1024xbf16>
    %cst_12 = arith.constant dense<0.000000e+00> : vector<2x1024xf32>
    %15 = tpu.matmul %13, %14, %cst_12 {dimension_numbers = #tpu.dot_dimension_numbers<[1], [0], [0], [1], [0, 0, 1, 1], [], []>} : vector<2x16xbf16>, vector<16x1024xbf16>, vector<2x1024xf32> -> vector<2x1024xf32>
    %cst_13 = arith.constant 0.000000e+00 : f32
    %16 = vector.broadcast %cst_13 : f32 to vector<2x1024xf32>
    %17 = arith.cmpf oge, %15, %16 : vector<2x1024xf32>
    %cst_14 = arith.constant 2.000000e-01 : f32
    %18 = vector.broadcast %cst_14 : f32 to vector<2x1024xf32>
    %19 = arith.mulf %18, %15 : vector<2x1024xf32>
    %20 = arith.select %17, %15, %19 : vector<2x1024xi1>, vector<2x1024xf32>
    %21 = arith.truncf %20 : vector<2x1024xf32> to vector<2x1024xbf16>
    %c0_15 = arith.constant 0 : index
    %c0_16 = arith.constant 0 : index
    %22 = vector.load %arg8[%c0_15, %c0_16] : memref<2x1024xbf16, #tpu.memory_space<vmem>>, vector<2x1024xbf16>
    tpu.vector_store %arg8[%c0_15, %c0_16], %21 {strides = array<i32>} : memref<2x1024xbf16, #tpu.memory_space<vmem>>, vector<2x1024xbf16>,
    %c0_17 = arith.constant 0 : index
    %c0_18 = arith.constant 0 : index
    %23 = vector.load %arg4[%c0_17, %c0_18] : memref<16x10xbf16, #tpu.memory_space<vmem>>, vector<16x10xbf16>
    %cst_19 = arith.constant dense<0.000000e+00> : vector<2x10xf32>
    %24 = tpu.matmul %13, %23, %cst_19 {dimension_numbers = #tpu.dot_dimension_numbers<[1], [0], [0], [1], [0, 0, 1, 1], [], []>} : vector<2x16xbf16>, vector<16x10xbf16>, vector<2x10xf32> -> vector<2x10xf32>
    %c0_20 = arith.constant 0 : index
    %c0_21 = arith.constant 0 : index
    %25 = vector.load %arg5[%c0_20, %c0_21] : memref<1x10xf32, #tpu.memory_space<vmem>>, vector<1x10xf32>
    %26 = vector.broadcast %25 : vector<1x10xf32> to vector<2x10xf32>
    %27 = arith.addf %24, %26 : vector<2x10xf32>
    %c0_22 = arith.constant 0 : index
    %c0_23 = arith.constant 0 : index
    %28 = vector.load %arg9[%c0_22, %c0_23] : memref<2x10xf32, #tpu.memory_space<vmem>>, vector<2x10xf32>
    tpu.vector_store %arg9[%c0_22, %c0_23], %27 {strides = array<i32>} : memref<2x10xf32, #tpu.memory_space<vmem>>, vector<2x10xf32>,
    return
  }
}

module attributes {stable_mosaic.version = 11 : i64} {
  func.func @kernel(%arg0: i32, %arg1: memref<32x576xbf16, #tpu.memory_space<vmem>>, %arg2: memref<576x32xbf16, #tpu.memory_space<vmem>>, %arg3: memref<32x32xbf16, #tpu.memory_space<vmem>>) attributes {dimension_semantics = [#tpu.dimension_semantics<parallel>], iteration_bounds = array<i64: 1>, scalar_prefetch = 0 : i64, scratch_operands = 0 : i64, tpu.core_type = #tpu.core_type<tc>, window_params = [{transform_indices = @transform_0, window_bounds = array<i64: 32, 576>}, {pipeline_mode = #tpu.pipeline_mode<synchronous>, transform_indices = @transform_1, window_bounds = array<i64: 576, 32>}, {transform_indices = @transform_2, window_bounds = array<i64: 32, 32>}]} {
    %c0 = arith.constant 0 : index
    %c0_0 = arith.constant 0 : index
    %0 = vector.load %arg1[%c0, %c0_0] : memref<32x576xbf16, #tpu.memory_space<vmem>>, vector<32x576xbf16>
    %c0_1 = arith.constant 0 : index
    %c0_2 = arith.constant 0 : index
    %1 = vector.load %arg2[%c0_1, %c0_2] : memref<576x32xbf16, #tpu.memory_space<vmem>>, vector<576x32xbf16>
    %cst = arith.constant dense<0.000000e+00> : vector<32x32xf32>
    %2 = tpu.matmul %0, %1, %cst {dimension_numbers = #tpu.dot_dimension_numbers<[1], [0], [0], [1], [0, 0, 1, 1], [], []>} : vector<32x576xbf16>, vector<576x32xbf16>, vector<32x32xf32> -> vector<32x32xf32>
    %cst_3 = arith.constant 0.000000e+00 : f32
    %3 = vector.broadcast %cst_3 : f32 to vector<32x32xf32>
    %4 = arith.cmpf oge, %2, %3 : vector<32x32xf32>
    %cst_4 = arith.constant 2.000000e-01 : f32
    %5 = vector.broadcast %cst_4 : f32 to vector<32x32xf32>
    %6 = arith.mulf %5, %2 : vector<32x32xf32>
    %7 = arith.select %4, %2, %6 : vector<32x32xi1>, vector<32x32xf32>
    %8 = arith.truncf %7 : vector<32x32xf32> to vector<32x32xbf16>
    %c0_5 = arith.constant 0 : index
    %c0_6 = arith.constant 0 : index
    %9 = vector.load %arg3[%c0_5, %c0_6] : memref<32x32xbf16, #tpu.memory_space<vmem>>, vector<32x32xbf16>
    tpu.vector_store %arg3[%c0_5, %c0_6], %8 {strides = array<i32>} : memref<32x32xbf16, #tpu.memory_space<vmem>>, vector<32x32xbf16>,
    return
  }
  func.func @transform_0(%arg0: i32) -> (i32, i32) {
    %c0_i32 = arith.constant 0 : i32
    %c0_i32_0 = arith.constant 0 : i32
    return %arg0, %c0_i32 : i32, i32
  }
  func.func @transform_1(%arg0: i32) -> (i32, i32) {
    %c0_i32 = arith.constant 0 : i32
    %c0_i32_0 = arith.constant 0 : i32
    %c0_i32_1 = arith.constant 0 : i32
    return %c0_i32, %c0_i32_0 : i32, i32
  }
  func.func @transform_2(%arg0: i32) -> (i32, i32) {
    %c0_i32 = arith.constant 0 : i32
    %c0_i32_0 = arith.constant 0 : i32
    return %arg0, %c0_i32 : i32, i32
  }
}

module attributes {stable_mosaic.version = 11 : i64} {
  func.func @kernel(%arg0: i32, %arg1: memref<128x72xbf16, #tpu.memory_space<vmem>>, %arg2: memref<72x12xbf16, #tpu.memory_space<vmem>>, %arg3: memref<128x12xf32, #tpu.memory_space<vmem>>) attributes {dimension_semantics = [#tpu.dimension_semantics<parallel>], iteration_bounds = array<i64: 1>, scalar_prefetch = 0 : i64, scratch_operands = 0 : i64, tpu.core_type = #tpu.core_type<tc>, window_params = [{transform_indices = @transform_0, window_bounds = array<i64: 128, 72>}, {pipeline_mode = #tpu.pipeline_mode<synchronous>, transform_indices = @transform_1, window_bounds = array<i64: 72, 12>}, {transform_indices = @transform_2, window_bounds = array<i64: 128, 12>}]} {
    %c0 = arith.constant 0 : index
    %c0_0 = arith.constant 0 : index
    %0 = vector.load %arg1[%c0, %c0_0] : memref<128x72xbf16, #tpu.memory_space<vmem>>, vector<128x72xbf16>
    %c0_1 = arith.constant 0 : index
    %c0_2 = arith.constant 0 : index
    %1 = vector.load %arg2[%c0_1, %c0_2] : memref<72x12xbf16, #tpu.memory_space<vmem>>, vector<72x12xbf16>
    %cst = arith.constant dense<0.000000e+00> : vector<128x12xf32>
    %2 = tpu.matmul %0, %1, %cst {dimension_numbers = #tpu.dot_dimension_numbers<[1], [0], [0], [1], [0, 0, 1, 1], [], []>} : vector<128x72xbf16>, vector<72x12xbf16>, vector<128x12xf32> -> vector<128x12xf32>
    %3 = arith.negf %2 : vector<128x12xf32>
    %4 = math.exp %3 : vector<128x12xf32>
    %cst_3 = arith.constant 1.000000e+00 : f32
    %5 = vector.broadcast %cst_3 : f32 to vector<128x12xf32>
    %6 = arith.addf %5, %4 : vector<128x12xf32>
    %7 = arith.divf %5, %6 : vector<128x12xf32>
    %c0_4 = arith.constant 0 : index
    %c0_5 = arith.constant 0 : index
    %8 = vector.load %arg3[%c0_4, %c0_5] : memref<128x12xf32, #tpu.memory_space<vmem>>, vector<128x12xf32>
    tpu.vector_store %arg3[%c0_4, %c0_5], %7 {strides = array<i32>} : memref<128x12xf32, #tpu.memory_space<vmem>>, vector<128x12xf32>,
    return
  }
  func.func @transform_0(%arg0: i32) -> (i32, i32) {
    %c0_i32 = arith.constant 0 : i32
    %c0_i32_0 = arith.constant 0 : i32
    return %arg0, %c0_i32 : i32, i32
  }
  func.func @transform_1(%arg0: i32) -> (i32, i32) {
    %c0_i32 = arith.constant 0 : i32
    %c0_i32_0 = arith.constant 0 : i32
    %c0_i32_1 = arith.constant 0 : i32
    return %c0_i32, %c0_i32_0 : i32, i32
  }
  func.func @transform_2(%arg0: i32) -> (i32, i32) {
    %c0_i32 = arith.constant 0 : i32
    %c0_i32_0 = arith.constant 0 : i32
    return %arg0, %c0_i32 : i32, i32
  }
}

</mosaic_0001>

<bundles_post_ra>
// kernel: vae_forward.5
= control target key start
LH: loop header
LB: loop body
LE: loop exit
PB: predicated region body
PF: predicated region fallthrough
CT: control target
= control target key end

     0   :  { %vm92_vm0 = vcmask 392192   ;;  %vm326_vm3 = vcmask 60416   ;;  %s568_s1 = inlined_call_operand.vmem [shape: bf16[48,8], index: 1, kind: input, shape index: {}]   ;;  %s569_s0 = inlined_call_operand.vmem [shape: bf16[128,48], index: 0, kind: input, shape index: {}]   ;;  %s570_s2 = inlined_call_operand.vmem [shape: bf16[128,8], index: 2, kind: output, shape index: {}]  }
   0x1   :  { %v437_v0 = vld [vmem:[%s568_s1 + $0x10] sm:$0xff]   ;;  %v438_v1 = vld [vmem:[%s568_s1 + $0x8] sm:$0xff]   ;;  %v439_v2 = vld [vmem:[%s568_s1] sm:$0xff]  }
   0x2   :  { %409 = vmatprep.subr.bf16.mxu0 %v437_v0  ;;  %431 = vmatprep.subr.bf16.mxu1 %v437_v0  ;;  %v440_v3 = vld [vmem:[%s569_s0] sm:$0xff]   ;;  %v442_v5 = vld [vmem:[%s569_s0 + $0x8] sm:$0xff]   ;;  %v444_v7 = vld [vmem:[%s569_s0 + $0x10] sm:$0xff]  }
   0x3   :  { %410 = vmatpush3.bf16.msra.mxu0 %v437_v0  ;;  %434 = vmatpush3.bf16.msra.mxu1 %v437_v0  ;;  %v441_v4 = vld [vmem:[%s569_s0 + $0x20] sm:$0xff]   ;;  %v443_v6 = vld [vmem:[%s569_s0 + $0x28] sm:$0xff]   ;;  %v445_v8 = vld [vmem:[%s569_s0 + $0x30] sm:$0xff]  }
   0x4   :  { %411 = vmatprep.subr.bf16.mxu0 %v438_v1  ;;  %432 = vmatprep.subr.bf16.mxu1 %v438_v1  ;;  %v446_v9 = vld [vmem:[%s569_s0 + $0x18] sm:$0xff]  }
   0x5   :  { %415 = vmatprep.mubr.msk.bf16.mxu0 %vm92_vm0, %v440_v3  ;;  %423 = vmatprep.mubr.msk.bf16.mxu1 %vm92_vm0, %v441_v4  ;;  %v447_v10 = vld [vmem:[%s569_s0 + $0x38] sm:$0xff]  }
   0x7   :  { %412 = vmatpush3.bf16.msra.mxu0 %v438_v1  ;;  %435 = vmatpush3.bf16.msra.mxu1 %v438_v1 }
   0x8   :  { %413 = vmatprep.subr.bf16.mxu0 %v439_v2  ;;  %433 = vmatprep.subr.bf16.mxu1 %v439_v2 }
   0xb   :  { %414 = vmatpush3.bf16.msra.mxu0 %v439_v2  ;;  %436 = vmatpush3.bf16.msra.mxu1 %v439_v2 }
   0xe   :  { %416 = vmatmul.mubr.msk.bf16.vlgmr.msra.gmra.mxu0 %vm92_vm0, %v442_v5  ;;  %424 = vmatmul.mubr.msk.bf16.vlgmr.msra.gmra.mxu1 %vm92_vm0, %v443_v6 }
   0xf   :  { %419 = vmatprep.mubr.msk.bf16.mxu0 %vm92_vm0, %v444_v7  ;;  %427 = vmatprep.mubr.msk.bf16.mxu1 %vm92_vm0, %v445_v8 }
  0x16   :  { %420 = vmatmul.mubr.msk.bf16.gmra.mxu0 %vm92_vm0, %v446_v9  ;;  %428 = vmatmul.mubr.msk.bf16.gmra.mxu1 %vm92_vm0, %v447_v10 }
  0xce   :  { %v417_v11 = vpop.f32.mrf.mxu0  ;;  %v425_v12 = vpop.f32.mrf.mxu1 }
  0xcf   :  { %vm216_vm1 = vcmp.ge.f32.partialorder %v417_v11, 0.0  ;;  %v232_v13 = vmul.f32 0.2, %v417_v11  ;;  %vm224_vm2 = vcmp.ge.f32.partialorder %v425_v12, 0.0  ;;  %v240_v14 = vmul.f32 0.2, %v425_v12 }
  0xd0   :  { %v151_v15 = vpop.f32.mrf.mxu0  ;;  %v183_v16 = vpop.f32.mrf.mxu1 }
  0xd1   :  { %v248_v17 = vsel %vm216_vm1, %v417_v11, %v232_v13  ;;  %v256_v18 = vsel %vm224_vm2, %v425_v12, %v240_v14  ;;  %vm214_vm4 = vcmp.ge.f32.partialorder %v151_v15, 0.0  ;;  %v230_v19 = vmul.f32 0.2, %v151_v15 }
  0xd2   :  { %v384_v20 = vpack.c.bf16 %v248_v17, %v248_v17  ;;  %v392_v21 = vpack.c.bf16 %v256_v18, %v256_v18  ;;  %vm222_vm5 = vcmp.ge.f32.partialorder %v183_v16, 0.0  ;;  %v238_v22 = vmul.f32 0.2, %v183_v16  ;;  %v418_v23 = vpop.f32.mrf.mxu0  ;;  %v426_v24 = vpop.f32.mrf.mxu1 }
  0xd3   :  { %v246_v25 = vsel %vm214_vm4, %v151_v15, %v230_v19  ;;  %vm217_vm6 = vcmp.ge.f32.partialorder %v418_v23, 0.0  ;;  %v233_v26 = vmul.f32 0.2, %v418_v23  ;;  %vm225_vm7 = vcmp.ge.f32.partialorder %v426_v24, 0.0 }
  0xd4   :  { %329 = vst.msk [vmem:[%s570_s2 + $0x8] sm:$0xf] %vm326_vm3, %v384_v20  ;;  %337 = vst.msk [vmem:[%s570_s2 + $0x28] sm:$0xf] %vm326_vm3, %v392_v21  ;;  %v382_v27 = vpack.c.bf16 %v246_v25, %v246_v25  ;;  %v254_v28 = vsel %vm222_vm5, %v183_v16, %v238_v22  ;;  %v241_v29 = vmul.f32 0.2, %v426_v24  ;;  %v154_v30 = vpop.f32.mrf.mxu0  ;;  %v186_v31 = vpop.f32.mrf.mxu1 }
  0xd5   :  { %v390_v32 = vpack.c.bf16 %v254_v28, %v254_v28  ;;  %v249_v33 = vsel %vm217_vm6, %v418_v23, %v233_v26  ;;  %vm215_vm8 = vcmp.ge.f32.partialorder %v154_v30, 0.0  ;;  %v231_v34 = vmul.f32 0.2, %v154_v30 }
  0xd6   :  { %327 = vst.msk [vmem:[%s570_s2] sm:$0xf] %vm326_vm3, %v382_v27  ;;  %v385_v35 = vpack.c.bf16 %v249_v33, %v249_v33  ;;  %v257_v36 = vsel %vm225_vm7, %v426_v24, %v241_v29  ;;  %vm223_vm9 = vcmp.ge.f32.partialorder %v186_v31, 0.0  ;;  %v239_v37 = vmul.f32 0.2, %v186_v31  ;;  %v421_v38 = vpop.f32.mrf.mxu0  ;;  %v429_v39 = vpop.f32.mrf.mxu1 }
  0xd7   :  { %335 = vst.msk [vmem:[%s570_s2 + $0x20] sm:$0xf] %vm326_vm3, %v390_v32  ;;  %v393_v40 = vpack.c.bf16 %v257_v36, %v257_v36  ;;  %v247_v41 = vsel %vm215_vm8, %v154_v30, %v231_v34  ;;  %vm220_vm10 = vcmp.ge.f32.partialorder %v421_v38, 0.0  ;;  %v236_v42 = vmul.f32 0.2, %v421_v38 }
  0xd8   :  { %330 = vst.msk [vmem:[%s570_s2 + $0xc] sm:$0xf] %vm326_vm3, %v385_v35  ;;  %v383_v43 = vpack.c.bf16 %v247_v41, %v247_v41  ;;  %v255_v44 = vsel %vm223_vm9, %v186_v31, %v239_v37  ;;  %vm228_vm11 = vcmp.ge.f32.partialorder %v429_v39, 0.0  ;;  %v244_v45 = vmul.f32 0.2, %v429_v39  ;;  %v167_v46 = vpop.f32.mrf.mxu0  ;;  %v199_v47 = vpop.f32.mrf.mxu1 }
  0xd9   :  { %338 = vst.msk [vmem:[%s570_s2 + $0x2c] sm:$0xf] %vm326_vm3, %v393_v40  ;;  %v391_v48 = vpack.c.bf16 %v255_v44, %v255_v44  ;;  %v252_v49 = vsel %vm220_vm10, %v421_v38, %v236_v42  ;;  %vm218_vm12 = vcmp.ge.f32.partialorder %v167_v46, 0.0  ;;  %v234_v50 = vmul.f32 0.2, %v167_v46 }
  0xda   :  { %328 = vst.msk [vmem:[%s570_s2 + $0x4] sm:$0xf] %vm326_vm3, %v383_v43  ;;  %v388_v51 = vpack.c.bf16 %v252_v49, %v252_v49  ;;  %v260_v52 = vsel %vm228_vm11, %v429_v39, %v244_v45  ;;  %vm226_vm13 = vcmp.ge.f32.partialorder %v199_v47, 0.0  ;;  %v242_v53 = vmul.f32 0.2, %v199_v47  ;;  %v422_v54 = vpop.f32.mrf.mxu0  ;;  %v430_v55 = vpop.f32.mrf.mxu1 }
  0xdb   :  { %336 = vst.msk [vmem:[%s570_s2 + $0x24] sm:$0xf] %vm326_vm3, %v391_v48  ;;  %v396_v56 = vpack.c.bf16 %v260_v52, %v260_v52  ;;  %v250_v57 = vsel %vm218_vm12, %v167_v46, %v234_v50  ;;  %vm221_vm14 = vcmp.ge.f32.partialorder %v422_v54, 0.0  ;;  %v237_v58 = vmul.f32 0.2, %v422_v54 }
  0xdc   :  { %333 = vst.msk [vmem:[%s570_s2 + $0x18] sm:$0xf] %vm326_vm3, %v388_v51  ;;  %v386_v59 = vpack.c.bf16 %v250_v57, %v250_v57  ;;  %v258_v60 = vsel %vm226_vm13, %v199_v47, %v242_v53  ;;  %vm229_vm15 = vcmp.ge.f32.partialorder %v430_v55, 0.0  ;;  %v245_v61 = vmul.f32 0.2, %v430_v55  ;;  %v170_v62 = vpop.f32.mrf.mxu0  ;;  %v202_v63 = vpop.f32.mrf.mxu1 }
  0xdd   :  { %341 = vst.msk [vmem:[%s570_s2 + $0x38] sm:$0xf] %vm326_vm3, %v396_v56  ;;  %v394_v0 = vpack.c.bf16 %v258_v60, %v258_v60  ;;  %v253_v1 = vsel %vm221_vm14, %v422_v54, %v237_v58  ;;  %vm219_vm0 = vcmp.ge.f32.partialorder %v170_v62, 0.0  ;;  %v235_v2 = vmul.f32 0.2, %v170_v62 }
  0xde   :  { %331 = vst.msk [vmem:[%s570_s2 + $0x10] sm:$0xf] %vm326_vm3, %v386_v59  ;;  %v389_v3 = vpack.c.bf16 %v253_v1, %v253_v1  ;;  %v261_v4 = vsel %vm229_vm15, %v430_v55, %v245_v61  ;;  %vm227_vm1 = vcmp.ge.f32.partialorder %v202_v63, 0.0  ;;  %v243_v5 = vmul.f32 0.2, %v202_v63 }
  0xdf   :  { %339 = vst.msk [vmem:[%s570_s2 + $0x30] sm:$0xf] %vm326_vm3, %v394_v0  ;;  %v397_v6 = vpack.c.bf16 %v261_v4, %v261_v4  ;;  %v251_v7 = vsel %vm219_vm0, %v170_v62, %v235_v2 }
  0xe0   :  { %334 = vst.msk [vmem:[%s570_s2 + $0x1c] sm:$0xf] %vm326_vm3, %v389_v3  ;;  %v387_v8 = vpack.c.bf16 %v251_v7, %v251_v7  ;;  %v259_v9 = vsel %vm227_vm1, %v202_v63, %v243_v5 }
  0xe1   :  { %342 = vst.msk [vmem:[%s570_s2 + $0x3c] sm:$0xf] %vm326_vm3, %v397_v6  ;;  %v395_v10 = vpack.c.bf16 %v259_v9, %v259_v9 }
  0xe2   :  { %332 = vst.msk [vmem:[%s570_s2 + $0x14] sm:$0xf] %vm326_vm3, %v387_v8 }
  0xe3   :  { %340 = vst.msk [vmem:[%s570_s2 + $0x34] sm:$0xf] %vm326_vm3, %v395_v10 }

// kernel: vae_forward.6
= control target key start
LH: loop header
LB: loop body
LE: loop exit
PB: predicated region body
PF: predicated region fallthrough
CT: control target
= control target key end

     0   :  { %vm169_vm1 = vcmask 519168   ;;  %s297_s1 = inlined_call_operand.vmem [shape: bf16[128,64], index: 1, kind: input, shape index: {}]   ;;  %s298_s0 = inlined_call_operand.vmem [shape: bf16[32,128], index: 0, kind: input, shape index: {}]   ;;  %s299_s2 = inlined_call_operand.vmem [shape: bf16[32,64], index: 2, kind: output, shape index: {}]  }
   0x1   :  { %v226_v0 = vld [vmem:[%s297_s1 + $0x38] sm:$0xff]   ;;  %v227_v1 = vld [vmem:[%s297_s1 + $0x30] sm:$0xff]   ;;  %v228_v2 = vld [vmem:[%s297_s1 + $0x28] sm:$0xff]  }
   0x2   :  { %206 = vmatprep.subr.bf16.mxu0 %v226_v0  ;;  %v229_v3 = vld [vmem:[%s297_s1 + $0x20] sm:$0xff]   ;;  %v230_v5 = vld [vmem:[%s297_s1 + $0x18] sm:$0xff]   ;;  %v231_v6 = vld [vmem:[%s297_s1 + $0x10] sm:$0xff]  }
   0x3   :  { %207 = vmatpush3.bf16.msra.mxu0 %v226_v0  ;;  %v234_v4 = vld [vmem:[%s298_s0] sm:$0xff]   ;;  %v232_v7 = vld [vmem:[%s297_s1 + $0x8] sm:$0xff]  }
   0x4   :  { %208 = vmatprep.subr.bf16.mxu0 %v227_v1  ;;  %222 = vmatprep.mubr.bf16.mxu0 %v234_v4  ;;  %v233_v8 = vld [vmem:[%s297_s1] sm:$0xff]   ;;  %v235_v9 = vld [vmem:[%s298_s0 + $0x8] sm:$0xff]  }
   0x7   :  { %209 = vmatpush3.bf16.msra.mxu0 %v227_v1 }
   0x8   :  { %210 = vmatprep.subr.bf16.mxu0 %v228_v2 }
   0xb   :  { %211 = vmatpush3.bf16.msra.mxu0 %v228_v2 }
   0xc   :  { %212 = vmatprep.subr.bf16.mxu0 %v229_v3 }
   0xf   :  { %213 = vmatpush3.bf16.msra.mxu0 %v229_v3 }
  0x10   :  { %214 = vmatprep.subr.bf16.mxu0 %v230_v5 }
  0x13   :  { %215 = vmatpush3.bf16.msra.mxu0 %v230_v5 }
  0x14   :  { %216 = vmatprep.subr.bf16.mxu0 %v231_v6 }
  0x17   :  { %217 = vmatpush3.bf16.msra.mxu0 %v231_v6 }
  0x18   :  { %218 = vmatprep.subr.bf16.mxu0 %v232_v7 }
  0x1b   :  { %219 = vmatpush3.bf16.msra.mxu0 %v232_v7 }
  0x1c   :  { %220 = vmatprep.subr.bf16.mxu0 %v233_v8 }
  0x1f   :  { %221 = vmatpush3.bf16.msra.mxu0 %v233_v8 }
  0x22   :  { %223 = vmatmul.mubr.bf16.vlgmr.msra.gmra.mxu0 %v235_v9 }
  0xe2   :  { %v224_v10 = vpop.f32.mrf.mxu0 }
  0xe3   :  { %vm143_vm0 = vcmp.ge.f32.partialorder %v224_v10, 0.0  ;;  %v147_v11 = vmul.f32 0.2, %v224_v10 }
  0xe4   :  { %v126_v12 = vpop.f32.mrf.mxu0 }
  0xe5   :  { %v151_v13 = vsel %vm143_vm0, %v224_v10, %v147_v11  ;;  %vm141_vm2 = vcmp.ge.f32.partialorder %v126_v12, 0.0  ;;  %v145_v14 = vmul.f32 0.2, %v126_v12 }
  0xe6   :  { %v194_v15 = vpack.c.bf16 %v151_v13, %v151_v13  ;;  %v225_v16 = vpop.f32.mrf.mxu0 }
  0xe7   :  { %v149_v17 = vsel %vm141_vm2, %v126_v12, %v145_v14  ;;  %vm144_vm3 = vcmp.ge.f32.partialorder %v225_v16, 0.0  ;;  %v148_v18 = vmul.f32 0.2, %v225_v16 }
  0xe8   :  { %172 = vst.msk [vmem:[%s299_s2 + $0x8] sm:$0xf] %vm169_vm1, %v194_v15  ;;  %v192_v19 = vpack.c.bf16 %v149_v17, %v149_v17  ;;  %v129_v20 = vpop.f32.mrf.mxu0 }
  0xe9   :  { %v152_v21 = vsel %vm144_vm3, %v225_v16, %v148_v18  ;;  %vm142_vm4 = vcmp.ge.f32.partialorder %v129_v20, 0.0  ;;  %v146_v22 = vmul.f32 0.2, %v129_v20 }
  0xea   :  { %170 = vst.msk [vmem:[%s299_s2] sm:$0xf] %vm169_vm1, %v192_v19  ;;  %v195_v23 = vpack.c.bf16 %v152_v21, %v152_v21 }
  0xeb   :  { %v150_v24 = vsel %vm142_vm4, %v129_v20, %v146_v22 }
  0xec   :  { %173 = vst.msk [vmem:[%s299_s2 + $0xc] sm:$0xf] %vm169_vm1, %v195_v23  ;;  %v193_v25 = vpack.c.bf16 %v150_v24, %v150_v24 }
  0xee   :  { %171 = vst.msk [vmem:[%s299_s2 + $0x4] sm:$0xf] %vm169_vm1, %v193_v25 }

// kernel: vae_forward.7
= control target key start
LH: loop header
LB: loop body
LE: loop exit
PB: predicated region body
PF: predicated region fallthrough
CT: control target
= control target key end

     0   :  { %15 = vsyncpa [#allocation3], 0  ;;  %v164_v28 = vlaneseq  ;;  %v1507_v36 = vmov 1966171168   ;;  %s1831_s0 = inlined_call_operand.vmem [shape: bf16[2,1024], index: 0, kind: input, shape index: {}]   ;;  %s1832_s1 = inlined_call_operand.vmem [shape: bf16[1024,32], index: 1, kind: input, shape index: {}]   ;;  %s1833_s2 = inlined_call_operand.vmem [shape: f32[2,16], index: 2, kind: input, shape index: {}]   ;;  %s1834_s3 = inlined_call_operand.vmem [shape: bf16[16,1024], index: 3, kind: input, shape index: {}]   ;;  %s1835_s4 = inlined_call_operand.vmem [shape: bf16[16,10], index: 4, kind: input, shape index: {}]   ;;  %s1836_s5 = inlined_call_operand.vmem [shape: f32[1,10], index: 5, kind: input, shape index: {}]   ;;  %s1837_s6 = inlined_call_operand.hbm [shape: f32[2,16], index: 6, kind: output, shape index: {0}]   ;;  %s1838_s7 = inlined_call_operand.hbm [shape: f32[2,16], index: 7, kind: output, shape index: {1}]   ;;  %s1839_s8 = inlined_call_operand.vmem [shape: bf16[2,1024], index: 8, kind: output, shape index: {2}]   ;;  %s1840_s9 = inlined_call_operand.hbm [shape: f32[2,10], index: 9, kind: output, shape index: {3}]  }
   0x1   :  { %v1375_v0 = vld [vmem:[%s1832_s1 + $0x78] sm:$0xff]   ;;  %v1379_v4 = vld [vmem:[%s1832_s1 + $0x70] sm:$0xff]   ;;  %v1383_v8 = vld [vmem:[%s1832_s1 + $0x68] sm:$0xff]   ;;  %v162_v37 = vunpack.c.l.s4 %v1507_v36 }
   0x2   :  { %v1376_v1 = vld [vmem:[%s1832_s1 + $0xf8] sm:$0xff]   ;;  %1271 = vmatprep.subr.bf16.mxu0 %v1375_v0  ;;  %v1380_v5 = vld [vmem:[%s1832_s1 + $0xf0] sm:$0xff]   ;;  %v1384_v9 = vld [vmem:[%s1832_s1 + $0xe8] sm:$0xff]   ;;  %v165_v33 = vshrl.u32 %v164_v28, 7 }
   0x3   :  { %v1377_v2 = vld [vmem:[%s1832_s1 + $0x38] sm:$0xff]   ;;  %1293 = vmatprep.subr.bf16.mxu1 %v1376_v1  ;;  %v1381_v6 = vld [vmem:[%s1832_s1 + $0x30] sm:$0xff]   ;;  %v1385_v10 = vld [vmem:[%s1832_s1 + $0x28] sm:$0xff]   ;;  %v163_v40 = vunpack.c.0.s8 %v162_v37 }
   0x4   :  { %v1378_v3 = vld [vmem:[%s1832_s1 + $0xb8] sm:$0xff]   ;;  %1272 = vmatpush3.bf16.msra.mxu0 %v1377_v2  ;;  %v1382_v7 = vld [vmem:[%s1832_s1 + $0xb0] sm:$0xff]   ;;  %v1386_v11 = vld [vmem:[%s1832_s1 + $0xa8] sm:$0xff]  }
   0x5   :  { %1294 = vmatpush3.bf16.msra.mxu1 %v1378_v3  ;;  %1273 = vmatprep.subr.bf16.mxu0 %v1379_v4  ;;  %v1387_v12 = vld [vmem:[%s1832_s1 + $0x60] sm:$0xff]   ;;  %v1391_v16 = vld [vmem:[%s1832_s1 + $0x58] sm:$0xff]   ;;  %v1395_v20 = vld [vmem:[%s1832_s1 + $0x50] sm:$0xff]   ;;  %v1670_v41 = vsub.s32 %v163_v40, %v165_v33 }
   0x6   :  { %1295 = vmatprep.subr.bf16.mxu1 %v1380_v5  ;;  %v1388_v13 = vld [vmem:[%s1832_s1 + $0xe0] sm:$0xff]   ;;  %v1392_v17 = vld [vmem:[%s1832_s1 + $0xd8] sm:$0xff]   ;;  %v1396_v21 = vld [vmem:[%s1832_s1 + $0xd0] sm:$0xff]  }
   0x7   :  { %v1389_v14 = vld [vmem:[%s1832_s1 + $0x20] sm:$0xff]   ;;  %v1393_v18 = vld [vmem:[%s1832_s1 + $0x18] sm:$0xff]   ;;  %v1397_v22 = vld [vmem:[%s1832_s1 + $0x10] sm:$0xff]  }
   0x8   :  { %1274 = vmatpush3.bf16.msra.mxu0 %v1381_v6  ;;  %v1390_v15 = vld [vmem:[%s1832_s1 + $0xa0] sm:$0xff]   ;;  %v1394_v19 = vld [vmem:[%s1832_s1 + $0x98] sm:$0xff]   ;;  %v1398_v23 = vld [vmem:[%s1832_s1 + $0x90] sm:$0xff]  }
   0x9   :  { %1296 = vmatpush3.bf16.msra.mxu1 %v1382_v7  ;;  %1275 = vmatprep.subr.bf16.mxu0 %v1383_v8  ;;  %v1399_v24 = vld [vmem:[%s1832_s1 + $0x48] sm:$0xff]   ;;  %v1403_v29 = vld [vmem:[%s1832_s1 + $0x40] sm:$0xff]   ;;  %v1408_v35 = vld [vmem:[%s1832_s1 + $0x178] sm:$0xff]  }
   0xa   :  { %1297 = vmatprep.subr.bf16.mxu1 %v1384_v9  ;;  %v1400_v25 = vld [vmem:[%s1832_s1 + $0xc8] sm:$0xff]   ;;  %v1404_v30 = vld [vmem:[%s1832_s1 + $0xc0] sm:$0xff]   ;;  %v1409_v38 = vld [vmem:[%s1832_s1 + $0x1f8] sm:$0xff]  }
   0xb   :  { %v1401_v26 = vld [vmem:[%s1832_s1 + $0x8] sm:$0xff]   ;;  %v1405_v31 = vld [vmem:[%s1832_s1] sm:$0xff]   ;;  %v1410_v48 = vld [vmem:[%s1832_s1 + $0x138] sm:$0xff]  }
   0xc   :  { %1276 = vmatpush3.bf16.msra.mxu0 %v1385_v10  ;;  %v1402_v27 = vld [vmem:[%s1832_s1 + $0x88] sm:$0xff]   ;;  %v1406_v32 = vld [vmem:[%s1832_s1 + $0x80] sm:$0xff]   ;;  %v1412_v51 = vld [vmem:[%s1832_s1 + $0x170] sm:$0xff]  }
   0xd   :  { %1298 = vmatpush3.bf16.msra.mxu1 %v1386_v11  ;;  %1277 = vmatprep.subr.bf16.mxu0 %v1387_v12  ;;  %v30_v34 = vld [vmem:[%s1831_s0] sm:$0xff]  ;;  %v1411_v53 = vld [vmem:[%s1832_s1 + $0x1b8] sm:$0xff]   ;;  %v1413_v54 = vld [vmem:[%s1832_s1 + $0x1f0] sm:$0xff]  }
   0xe   :  { %1299 = vmatprep.subr.bf16.mxu1 %v1388_v13  ;;  %v160_v39 = vcombine.high %v30_v34, %v30_v34  ;;  %v167_v42 = vrot.slane %v30_v34, %v1670_v41  ;;  %v1414_v56 = vld [vmem:[%s1832_s1 + $0x130] sm:$0xff]   ;;  %v1416_v57 = vld [vmem:[%s1832_s1 + $0x168] sm:$0xff]   ;;  %v1420_v61 = vld [vmem:[%s1832_s1 + $0x160] sm:$0xff]  }
   0xf   :  { %v1415_v58 = vld [vmem:[%s1832_s1 + $0x1b0] sm:$0xff]   ;;  %v1417_v59 = vld [vmem:[%s1832_s1 + $0x1e8] sm:$0xff]   ;;  %v1421_v63 = vld [vmem:[%s1832_s1 + $0x1e0] sm:$0xff]  }
  0x10   :  { %1278 = vmatpush3.bf16.msra.mxu0 %v1389_v14  ;;  %v1674_v43 = vrot.slane %v160_v39, %v1670_v41  ;;  %v175_v44 = vcombine.high %v167_v42, %v167_v42  ;;  %v183_v45 = vrot.slane %v167_v42, %v1670_v41  ;;  %v1418_v60 = vld [vmem:[%s1832_s1 + $0x128] sm:$0xff]   ;;  %v1422_v0 = vld [vmem:[%s1832_s1 + $0x120] sm:$0xff]   ;;  %v1424_v1 = vld [vmem:[%s1832_s1 + $0x158] sm:$0xff]  }
  0x11   :  { %1300 = vmatpush3.bf16.msra.mxu1 %v1390_v15  ;;  %1279 = vmatprep.subr.bf16.mxu0 %v1391_v16  ;;  %v1419_v62 = vld [vmem:[%s1832_s1 + $0x1a8] sm:$0xff]   ;;  %v1423_v2 = vld [vmem:[%s1832_s1 + $0x1a0] sm:$0xff]   ;;  %v1425_v3 = vld [vmem:[%s1832_s1 + $0x1d8] sm:$0xff]  }
  0x12   :  { %1301 = vmatprep.subr.bf16.mxu1 %v1392_v17  ;;  %v176_v46 = vcombine.high %v1674_v43, %v1674_v43  ;;  %v197_v47 = vrot.slane %v175_v44, %v1670_v41  ;;  %v205_v50 = vcombine.high %v183_v45, %v183_v45  ;;  %v1426_v4 = vld [vmem:[%s1832_s1 + $0x118] sm:$0xff]   ;;  %v1428_v5 = vld [vmem:[%s1832_s1 + $0x150] sm:$0xff]   ;;  %v1432_v9 = vld [vmem:[%s1832_s1 + $0x148] sm:$0xff]  }
  0x13   :  { %v1427_v6 = vld [vmem:[%s1832_s1 + $0x198] sm:$0xff]   ;;  %v1429_v7 = vld [vmem:[%s1832_s1 + $0x1d0] sm:$0xff]  }
  0x14   :  { %1280 = vmatpush3.bf16.msra.mxu0 %v1393_v18  ;;  %v204_v49 = vrot.slane %v176_v46, %v1670_v41  ;;  %633 = vmatprep.mubr.bf16.mxu0 %v197_v47  ;;  %v207_v52 = vcombine.high %v197_v47, %v197_v47  ;;  %v1430_v8 = vld [vmem:[%s1832_s1 + $0x110] sm:$0xff]  }
  0x15   :  { %1302 = vmatpush3.bf16.msra.mxu1 %v1394_v19  ;;  %1281 = vmatprep.subr.bf16.mxu0 %v1395_v20  ;;  %v1431_v10 = vld [vmem:[%s1832_s1 + $0x190] sm:$0xff]  }
  0x16   :  { %1303 = vmatprep.subr.bf16.mxu1 %v1396_v21  ;;  %v208_v55 = vcombine.high %v204_v49, %v204_v49  ;;  %673 = vmatprep.mubr.bf16.mxu1 %v207_v52 }
  0x18   :  { %1282 = vmatpush3.bf16.msra.mxu0 %v1397_v22 }
  0x19   :  { %1304 = vmatpush3.bf16.msra.mxu1 %v1398_v23  ;;  %1283 = vmatprep.subr.bf16.mxu0 %v1399_v24 }
  0x1a   :  { %1305 = vmatprep.subr.bf16.mxu1 %v1400_v25 }
  0x1c   :  { %1284 = vmatpush3.bf16.msra.mxu0 %v1401_v26 }
  0x1d   :  { %1306 = vmatpush3.bf16.msra.mxu1 %v1402_v27  ;;  %1285 = vmatprep.subr.bf16.mxu0 %v1403_v29 }
  0x1e   :  { %1307 = vmatprep.subr.bf16.mxu1 %v1404_v30 }
  0x20   :  { %1286 = vmatpush3.bf16.msra.mxu0 %v1405_v31 }
  0x21   :  { %1308 = vmatpush3.bf16.msra.mxu1 %v1406_v32  ;;  %1315 = vmatprep.subr.bf16.mxu0 %v1408_v35 }
  0x22   :  { %1337 = vmatprep.subr.bf16.mxu1 %v1409_v38 }
  0x23   :  { %634 = vmatmul.mubr.bf16.vlgmr.msra.gmra.mxu0 %v183_v45 }
  0x24   :  { %1316 = vmatpush3.bf16.msra.mxu0 %v1410_v48  ;;  %674 = vmatmul.mubr.bf16.vlgmr.msra.gmra.mxu1 %v205_v50 }
  0x25   :  { %1317 = vmatprep.subr.bf16.mxu0 %v1412_v51  ;;  %1338 = vmatpush3.bf16.msra.mxu1 %v1411_v53 }
  0x26   :  { %713 = vmatprep.mubr.bf16.mxu0 %v204_v49  ;;  %1339 = vmatprep.subr.bf16.mxu1 %v1413_v54 }
  0x27   :  { %753 = vmatprep.mubr.bf16.mxu1 %v208_v55 }
  0x28   :  { %1318 = vmatpush3.bf16.msra.mxu0 %v1414_v56 }
  0x29   :  { %1319 = vmatprep.subr.bf16.mxu0 %v1416_v57  ;;  %1340 = vmatpush3.bf16.msra.mxu1 %v1415_v58 }
  0x2a   :  { %1341 = vmatprep.subr.bf16.mxu1 %v1417_v59 }
  0x2c   :  { %1320 = vmatpush3.bf16.msra.mxu0 %v1418_v60 }
  0x2d   :  { %1321 = vmatprep.subr.bf16.mxu0 %v1420_v61  ;;  %1342 = vmatpush3.bf16.msra.mxu1 %v1419_v62 }
  0x2e   :  { %1343 = vmatprep.subr.bf16.mxu1 %v1421_v63 }
  0x30   :  { %1322 = vmatpush3.bf16.msra.mxu0 %v1422_v0 }
  0x31   :  { %1323 = vmatprep.subr.bf16.mxu0 %v1424_v1  ;;  %1344 = vmatpush3.bf16.msra.mxu1 %v1423_v2 }
  0x32   :  { %1345 = vmatprep.subr.bf16.mxu1 %v1425_v3 }
  0x34   :  { %1324 = vmatpush3.bf16.msra.mxu0 %v1426_v4 }
  0x35   :  { %1325 = vmatprep.subr.bf16.mxu0 %v1428_v5  ;;  %1346 = vmatpush3.bf16.msra.mxu1 %v1427_v6 }
  0x36   :  { %16 = vsyncpa [#allocation5], 0  ;;  %1347 = vmatprep.subr.bf16.mxu1 %v1429_v7  ;;  %v1433_v11 = vld [vmem:[%s1832_s1 + $0x1c8] sm:$0xff]   ;;  %v1436_v13 = vld [vmem:[%s1832_s1 + $0x140] sm:$0xff]   ;;  %v190_v17 = vrot.slane %v1674_v43, %v1670_v41  ;;  %vm761_vm0 = vcmask 123904   ;;  %v1508_v57 = vmov 0  }
  0x37   :  { %v1434_v12 = vld [vmem:[%s1832_s1 + $0x108] sm:$0xff]   ;;  %v1437_v15 = vld [vmem:[%s1832_s1 + $0x1c0] sm:$0xff]   ;;  %v781_v54 = vld [vmem:[%s1834_s3 + $0x10] sm:$0xff]  ;;  %s1509_s24 = smov 112   ;;  %vm827_vm1 = vcmask 130048   ;;  %v1510_v6 = vmov 0.0  }
  0x38   :  { %1326 = vmatpush3.bf16.msra.mxu0 %v1430_v8  ;;  %v1435_v14 = vld [vmem:[%s1832_s1 + $0x188] sm:$0xff]   ;;  %v1438_v16 = vld [vmem:[%s1832_s1 + $0x100] sm:$0xff]   ;;  %v206_v19 = vcombine.high %v190_v17, %v190_v17  ;;  %v785_v55 = vld [vmem:[%s1834_s3 + $0x30] sm:$0xff]  ;;  %vm1511_vm2 = vmmov 0   ;;  %s1512_s27 = smov [#allocation4]   ;;  %s1513_s29 = smov [#allocation2]  }
  0x39   :  { %1327 = vmatprep.subr.bf16.mxu0 %v1432_v9  ;;  %1348 = vmatpush3.bf16.msra.mxu1 %v1431_v10  ;;  %v1439_v18 = vld [vmem:[%s1832_s1 + $0x180] sm:$0xff]   ;;  %v780_v22 = vld [vmem:[%s1834_s3 + $0x8] sm:$0xff]  ;;  %v782_v56 = vld [vmem:[%s1834_s3 + $0x18] sm:$0xff]  ;;  %v1256_v58 = vcombine.low %v781_v54, %v785_v55  ;;  %v1257_v59 = vcombine.high %v781_v54, %v785_v55  ;;  %s1159_s28 = sshll.u32 %s1512_s27, 4  ;;  %s1149_s30 = sshll.u32 %s1513_s29, 4  ;;  %s1160_s28 = int_to_ptr.vmem [resolvable:$true] %s1159_s28  ;;  %s1150_s30 = int_to_ptr.vmem [resolvable:$true] %s1149_s30 }
  0x3a   :  { %1349 = vmatprep.subr.bf16.mxu1 %v1433_v11  ;;  %v779_v20 = vld [vmem:[%s1834_s3] sm:$0xff]  ;;  %v784_v25 = vld [vmem:[%s1834_s3 + $0x28] sm:$0xff]  ;;  %v786_v60 = vld [vmem:[%s1834_s3 + $0x38] sm:$0xff]  ;;  %s1443_s10 = scalar_lea.vmem %s1160_s28, 32  ;;  %p1448_p1 = scmp.lt.s32.totalorder %s1160_s28, %s1160_s28 }
  0x3b   :  { %v783_v21 = vld [vmem:[%s1834_s3 + $0x20] sm:$0xff]  ;;  %v1254_v26 = vcombine.low %v780_v22, %v784_v25  ;;  %v1255_v27 = vcombine.high %v780_v22, %v784_v25  ;;  %v1258_v61 = vcombine.low %v782_v56, %v786_v60  ;;  %v1259_v62 = vcombine.high %v782_v56, %v786_v60  ;;  %p1444_p0 = scmp.ne.s32.totalorder %s1160_s28, %s1443_s10  ;;  %p1449_p2 = scmp.lt.s32.totalorder %s1443_s10, %s1443_s10 }
  0x3c   :  { %1328 = vmatpush3.bf16.msra.mxu0 %v1434_v12  ;;  %v1252_v23 = vcombine.low %v779_v20, %v783_v21  ;;  %v1253_v24 = vcombine.high %v779_v20, %v783_v21  ;;  %v768_v0 = vld [vmem:[%s1833_s2] sm:$0x3] }
  0x3d   :  { %1329 = vmatprep.subr.bf16.mxu0 %v1436_v13  ;;  %1350 = vmatpush3.bf16.msra.mxu1 %v1435_v14  ;;  %v1440_v7 = vld [vmem:[%s1835_s4] sm:$0xff]   ;;  %p1450_p3 = por %p1449_p2, %p1448_p1 }
  0x3e   :  { %1351 = vmatprep.subr.bf16.mxu1 %v1437_v15 }
  0x3f   :  { %p1451_p4 = pnand %p1450_p3, %p1444_p0 }
  0x40   :  { %1330 = vmatpush3.bf16.msra.mxu0 %v1438_v16 }
  0x41   :  { %1352 = vmatpush3.bf16.msra.mxu1 %v1439_v18  ;;  %845 = vmatprep.subr.bf16.mxu0 %v1253_v24 }
  0x42   :  { %886 = vmatprep.subr.bf16.mxu1 %v1255_v27 }
  0x43   :  { %714 = vmatmul.mubr.bf16.vlgmr.msra.gmra.mxu0 %v190_v17 }
  0x44   :  { %754 = vmatmul.mubr.bf16.vlgmr.msra.gmra.mxu1 %v206_v19  ;;  %846 = vmatpush1.bf16.msra.mxu0 %v1252_v23 }
  0x45   :  { %887 = vmatpush1.bf16.msra.mxu1 %v1254_v26  ;;  %863 = vmatprep.mubr.bf16.mxu0 %v1508_v57 }
  0x46   :  { %904 = vmatprep.mubr.bf16.mxu1 %v1508_v57  ;;  %927 = vmatprep.subr.bf16.mxu0 %v1257_v59 }
  0x47   :  { %968 = vmatprep.subr.bf16.mxu1 %v1259_v62 }
  0xe3   :  { %v1287_v28 = vpop.f32.mrf.mxu0 }
  0xe4   :  { %v1309_v29 = vpop.f32.mrf.mxu1 }
  0xe5   :  { %v1288_v30 = vpop.f32.mrf.mxu0 }
  0xe6   :  { %v1310_v31 = vpop.f32.mrf.mxu1  ;;  %v1289_v36 = vadd.f32 %v1288_v30, %v1287_v28 }
  0xe7   :  { %v1290_v32 = vpop.f32.mrf.mxu0  ;;  %v1311_v37 = vadd.f32 %v1310_v31, %v1309_v29 }
  0xe8   :  { %v1312_v33 = vpop.f32.mrf.mxu1 }
  0xe9   :  { %v1291_v34 = vpop.f32.mrf.mxu0  ;;  %v676_v42 = vadd.f32 %v1311_v37, %v1289_v36 }
  0xea   :  { %v1313_v35 = vpop.f32.mrf.mxu1 }
 0x103   :  { %v1331_v38 = vpop.f32.mrf.mxu0 }
 0x104   :  { %v1353_v39 = vpop.f32.mrf.mxu1 }
 0x105   :  { %v1332_v40 = vpop.f32.mrf.mxu0 }
 0x106   :  { %v1333_v43 = vadd.f32 %v1332_v40, %v1331_v38  ;;  %v1354_v44 = vpop.f32.mrf.mxu1 }
 0x107   :  { %v1334_v45 = vpop.f32.mrf.mxu0  ;;  %v1355_v47 = vadd.f32 %v1354_v44, %v1353_v39 }
 0x108   :  { %v716_v46 = vadd.f32 %v1333_v43, %v676_v42  ;;  %v1356_v48 = vpop.f32.mrf.mxu1 }
 0x109   :  { %v1335_v49 = vpop.f32.mrf.mxu0 }
 0x10a   :  { %v756_v50 = vadd.f32 %v1355_v47, %v716_v46  ;;  %v1357_v51 = vpop.f32.mrf.mxu1 }
 0x10c   :  { %v769_v52 = vmul.f32 0.5, %v756_v50  ;;  %762 = vst.msk [vmem:[#allocation2] sm:$0x3] %vm761_vm0, %v756_v50 }
 0x10e   :  { %v770_v53 = vmul.f32 1.442695, %v769_v52 }
 0x110   :  { %1441 = vpow2.f32 %v770_v53 }
 0x11d   :  { %v1442_v63 = vpop.eup %1441 }
 0x11e   :  { %773 = vrot.lane.b32.xlu0 %v1442_v63, %s1509_s24 }
 0x122   :  { %764 = vrot.lane.b32.xlu0 %v756_v50, %s1509_s24 }
 0x190   :  { %v774_v1 = vpop.permute.xlu0 %773 }
 0x191   :  { %v776_v2 = vmul.f32 %v774_v1, %v768_v0 }
 0x193   :  { %v777_v3 = vadd.f32 %v776_v2, %v756_v50 }
 0x194   :  { %v765_v4 = vpop.permute.xlu0 %764 }
 0x195   :  { %v778_v5 = vpack.c.bf16 %v777_v3, %v777_v3  ;;  %767 = vst.msk [vmem:[#allocation4] sm:$0x3] %vm761_vm0, %v765_v4 }
 0x197   :  { %1260 = vmatmul.mubr.msk.bf16.vlgmr.msra.gmra.mxu0 %vm827_vm1, %v778_v5  ;;  %1261 = vmatmul.mubr.msk.bf16.vlgmr.msra.gmra.mxu1 %vm827_vm1, %v778_v5 }
 0x198   :  { %928 = vmatpush1.bf16.msra.mxu0 %v1256_v58  ;;  %969 = vmatpush1.bf16.msra.mxu1 %v1258_v61 }
 0x199   :  { %945 = vmatprep.mubr.bf16.mxu0 %v1508_v57  ;;  %986 = vmatprep.mubr.bf16.mxu1 %v1508_v57 }
 0x19a   :  { %1361 = vmatprep.subr.bf16.mxu0 %v1510_v6 }
 0x19f   :  { %1262 = vmatmul.mubr.msk.bf16.vlgmr.msra.gmra.mxu0 %vm827_vm1, %v778_v5  ;;  %1263 = vmatmul.mubr.msk.bf16.vlgmr.msra.gmra.mxu1 %vm827_vm1, %v778_v5 }
 0x1a0   :  { %1362 = vmatpush3.bf16.msra.mxu0 %v1440_v7  ;;  %1363 = vmatprep.mubr.msk.bf16.mxu0 %vm1511_vm2, %v1510_v6 }
 0x1a7   :  { %1364 = vmatmul.mubr.msk.bf16.vlgmr.msra.gmra.mxu0 %vm827_vm1, %v778_v5 }
 0x1a8   :  { %1454 = shalt.err (!%p1451_p4)
}
 0x1a9   :  { %1162 = dma.vmem_to_hbm [thread:$0]  %s1160_s28, 32, %s1838_s7, [#allocation5]  }
 0x1aa   :  { %s1463_s12 = scalar_lea.vmem %s1150_s30, 32  ;;  %p1468_p6 = scmp.lt.s32.totalorder %s1150_s30, %s1150_s30 }
 0x1ab   :  { %p1464_p5 = scmp.ne.s32.totalorder %s1150_s30, %s1463_s12  ;;  %p1469_p7 = scmp.lt.s32.totalorder %s1463_s12, %s1463_s12 }
 0x1ad   :  { %p1470_p8 = por %p1469_p7, %p1468_p6 }
 0x1af   :  { %p1471_p9 = pnand %p1470_p8, %p1464_p5 }
 0x1b1   :  { %1474 = shalt.err (!%p1471_p9)
}
 0x1b2   :  { %1152 = dma.vmem_to_hbm [thread:$0]  %s1150_s30, 32, %s1837_s6, [#allocation3]   ;;  %v1268_v46 = vld [vmem:[%s1836_s5] ss:$0 sm:$0xff]  ;;  %vm1141_vm11 = vcmask 74752  }
 0x1b3   :  { %s1514_s15 = smov [#allocation6]  }
 0x1b4   :  { %s1171_s1 = sshll.u32 %s1514_s15, 4  ;;  %s1172_s1 = int_to_ptr.vmem [resolvable:$true] %s1171_s1 }
 0x1b5   :  { %s1483_s0 = scalar_lea.vmem %s1172_s1, 32  ;;  %p1488_p11 = scmp.lt.s32.totalorder %s1172_s1, %s1172_s1 }
 0x1b6   :  { %p1484_p10 = scmp.ne.s32.totalorder %s1172_s1, %s1483_s0  ;;  %p1489_p12 = scmp.lt.s32.totalorder %s1483_s0, %s1483_s0 }
 0x1b8   :  { %p1490_p13 = por %p1489_p12, %p1488_p11 }
 0x1ba   :  { %p1491_p0 = pnand %p1490_p13, %p1484_p10 }
 0x257   :  { %v865_v8 = vpop.f32.mrf.mxu0  ;;  %v906_v9 = vpop.f32.mrf.mxu1 }
 0x258   :  { %v1003_v12 = vmul.f32 0.2, %v865_v8  ;;  %v1005_v14 = vmul.f32 0.2, %v906_v9  ;;  %vm995_vm5 = vcmp.ge.f32.partialorder %v865_v8, 0.0  ;;  %vm997_vm6 = vcmp.ge.f32.partialorder %v906_v9, 0.0 }
 0x259   :  { %v867_v10 = vpop.f32.mrf.mxu0  ;;  %v908_v11 = vpop.f32.mrf.mxu1 }
 0x25a   :  { %vm996_vm3 = vcmp.ge.f32.partialorder %v867_v10, 0.0  ;;  %v1004_v13 = vmul.f32 0.2, %v867_v10  ;;  %vm998_vm4 = vcmp.ge.f32.partialorder %v908_v11, 0.0  ;;  %v1006_v15 = vmul.f32 0.2, %v908_v11 }
 0x25b   :  { %v869_v16 = vpop.f32.mrf.mxu0  ;;  %v910_v17 = vpop.f32.mrf.mxu1  ;;  %v1011_v22 = vsel %vm995_vm5, %v865_v8, %v1003_v12  ;;  %v1013_v23 = vsel %vm997_vm6, %v906_v9, %v1005_v14 }
 0x25c   :  { %v1012_v18 = vsel %vm996_vm3, %v867_v10, %v1004_v13  ;;  %v1014_v19 = vsel %vm998_vm4, %v908_v11, %v1006_v15 }
 0x25d   :  { %v870_v20 = vpop.f32.mrf.mxu0  ;;  %v911_v21 = vpop.f32.mrf.mxu1  ;;  %v1264_v26 = vpack.c.bf16 %v1012_v18, %v1011_v22  ;;  %v1265_v27 = vpack.c.bf16 %v1014_v19, %v1013_v23 }
 0x25f   :  { %v947_v24 = vpop.f32.mrf.mxu0  ;;  %v988_v25 = vpop.f32.mrf.mxu1  ;;  %v1045_v36 = vrot.slane %v1264_v26, %v1670_v41  ;;  %v1052_v37 = vrot.slane %v1265_v27, %v1670_v41 }
 0x260   :  { %v1007_v28 = vmul.f32 0.2, %v947_v24  ;;  %vm999_vm7 = vcmp.ge.f32.partialorder %v947_v24, 0.0  ;;  %v1009_v29 = vmul.f32 0.2, %v988_v25  ;;  %vm1001_vm8 = vcmp.ge.f32.partialorder %v988_v25, 0.0 }
 0x261   :  { %v949_v30 = vpop.f32.mrf.mxu0  ;;  %v990_v31 = vpop.f32.mrf.mxu1  ;;  %v1067_v50 = vcombine.low %v1045_v36, %v1052_v37 }
 0x262   :  { %vm1000_vm9 = vcmp.ge.f32.partialorder %v949_v30, 0.0  ;;  %v1008_v32 = vmul.f32 0.2, %v949_v30  ;;  %vm1002_vm10 = vcmp.ge.f32.partialorder %v990_v31, 0.0  ;;  %v1010_v33 = vmul.f32 0.2, %v990_v31 }
 0x263   :  { %v951_v34 = vpop.f32.mrf.mxu0  ;;  %v992_v35 = vpop.f32.mrf.mxu1  ;;  %v1015_v38 = vsel %vm999_vm7, %v947_v24, %v1007_v28  ;;  %v1017_v40 = vsel %vm1001_vm8, %v988_v25, %v1009_v29 }
 0x264   :  { %v1016_v39 = vsel %vm1000_vm9, %v949_v30, %v1008_v32  ;;  %v1018_v43 = vsel %vm1002_vm10, %v990_v31, %v1010_v33 }
 0x265   :  { %v1266_v42 = vpack.c.bf16 %v1016_v39, %v1015_v38  ;;  %v952_v44 = vpop.f32.mrf.mxu0  ;;  %v993_v45 = vpop.f32.mrf.mxu1  ;;  %v1267_v47 = vpack.c.bf16 %v1018_v43, %v1017_v40 }
 0x267   :  { %v1059_v48 = vrot.slane %v1266_v42, %v1670_v41  ;;  %v1135_v49 = vpop.f32.mrf.mxu0  ;;  %v1066_v51 = vrot.slane %v1267_v47, %v1670_v41 }
 0x268   :  { %v1136_v52 = vadd.f32 %v1268_v46, %v1135_v49 }
 0x269   :  { %v1365_v53 = vpop.f32.mrf.mxu0  ;;  %v1068_v54 = vcombine.low %v1059_v48, %v1066_v51 }
 0x26a   :  { %1142 = vst.msk [vmem:[#allocation6] sm:$0x3] %vm1141_vm11, %v1136_v52 }
 0x26b   :  { %v1138_v55 = vpop.f32.mrf.mxu0 }
 0x26c   :  { %1494 = shalt.err (!%p1491_p0)
}
 0x26d   :  { %1174 = dma.vmem_to_hbm [thread:$0]  %s1172_s1, 32, %s1840_s9, [#allocation5]   ;;  %v1075_v56 = vrot.slane %v1067_v50, %v1670_v41  ;;  %v1082_v57 = vrot.slane %v1068_v54, %v1670_v41  ;;  %v1366_v58 = vpop.f32.mrf.mxu0 }
 0x26f   :  { %v1083_v59 = vcombine.low %v1075_v56, %v1082_v57 }
 0x271   :  { %1085 = vst [vmem:[%s1839_s8] sm:$0xff] %v1083_v59 }
 0x272   :  { %1503 = dma.done.wait [#allocation3], 32  }
 0x273   :  { %1504 = vsyncadd [#allocation3], 4294967264 }
 0x274   :  { %1505 = dma.done.wait [#allocation5], 64  }
 0x275   :  { %1506 = vsyncadd [#allocation5], 4294967232 }
 0x276   :  { %1186 = vsyncpa [#allocation3], 1 }
 0x277   :  { %1187 = vsyncpa [#allocation5], 1 }

// kernel: vae_forward.8
= control target key start
LH: loop header
LB: loop body
LE: loop exit
PB: predicated region body
PF: predicated region fallthrough
CT: control target
= control target key end

     0   :  { %vm362_vm0 = vcmask 523264   ;;  %vm544_vm2 = vcmask 257024   ;;  %s902_s1 = inlined_call_operand.vmem [shape: bf16[576,32], index: 1, kind: input, shape index: {}]   ;;  %s903_s0 = inlined_call_operand.vmem [shape: bf16[32,576], index: 0, kind: input, shape index: {}]   ;;  %s904_s2 = inlined_call_operand.vmem [shape: bf16[32,32], index: 2, kind: output, shape index: {}]  }
   0x1   :  { %v683_v0 = vld [vmem:[%s902_s1 + $0x78] sm:$0xff]   ;;  %v687_v4 = vld [vmem:[%s902_s1 + $0x70] sm:$0xff]   ;;  %v691_v8 = vld [vmem:[%s902_s1 + $0x68] sm:$0xff]  }
   0x2   :  { %v684_v1 = vld [vmem:[%s902_s1 + $0xf8] sm:$0xff]   ;;  %609 = vmatprep.subr.bf16.mxu0 %v683_v0  ;;  %v688_v5 = vld [vmem:[%s902_s1 + $0xf0] sm:$0xff]   ;;  %v692_v9 = vld [vmem:[%s902_s1 + $0xe8] sm:$0xff]  }
   0x3   :  { %v685_v2 = vld [vmem:[%s902_s1 + $0x38] sm:$0xff]   ;;  %637 = vmatprep.subr.bf16.mxu1 %v684_v1  ;;  %v689_v6 = vld [vmem:[%s902_s1 + $0x30] sm:$0xff]   ;;  %v693_v10 = vld [vmem:[%s902_s1 + $0x28] sm:$0xff]  }
   0x4   :  { %v686_v3 = vld [vmem:[%s902_s1 + $0xb8] sm:$0xff]   ;;  %610 = vmatpush3.bf16.msra.mxu0 %v685_v2  ;;  %v690_v7 = vld [vmem:[%s902_s1 + $0xb0] sm:$0xff]   ;;  %v694_v11 = vld [vmem:[%s902_s1 + $0xa8] sm:$0xff]  }
   0x5   :  { %638 = vmatpush3.bf16.msra.mxu1 %v686_v3  ;;  %611 = vmatprep.subr.bf16.mxu0 %v687_v4  ;;  %v695_v12 = vld [vmem:[%s902_s1 + $0x60] sm:$0xff]   ;;  %v699_v16 = vld [vmem:[%s902_s1 + $0x58] sm:$0xff]   ;;  %v703_v20 = vld [vmem:[%s902_s1 + $0x50] sm:$0xff]  }
   0x6   :  { %639 = vmatprep.subr.bf16.mxu1 %v688_v5  ;;  %v696_v13 = vld [vmem:[%s902_s1 + $0xe0] sm:$0xff]   ;;  %v700_v17 = vld [vmem:[%s902_s1 + $0xd8] sm:$0xff]   ;;  %v704_v21 = vld [vmem:[%s902_s1 + $0xd0] sm:$0xff]  }
   0x7   :  { %v697_v14 = vld [vmem:[%s902_s1 + $0x20] sm:$0xff]   ;;  %v701_v18 = vld [vmem:[%s902_s1 + $0x18] sm:$0xff]   ;;  %v705_v22 = vld [vmem:[%s902_s1 + $0x10] sm:$0xff]  }
   0x8   :  { %612 = vmatpush3.bf16.msra.mxu0 %v689_v6  ;;  %v698_v15 = vld [vmem:[%s902_s1 + $0xa0] sm:$0xff]   ;;  %v702_v19 = vld [vmem:[%s902_s1 + $0x98] sm:$0xff]   ;;  %v706_v23 = vld [vmem:[%s902_s1 + $0x90] sm:$0xff]  }
   0x9   :  { %640 = vmatpush3.bf16.msra.mxu1 %v690_v7  ;;  %613 = vmatprep.subr.bf16.mxu0 %v691_v8  ;;  %v707_v24 = vld [vmem:[%s902_s1 + $0x48] sm:$0xff]   ;;  %v711_v28 = vld [vmem:[%s902_s1 + $0x40] sm:$0xff]   ;;  %v721_v36 = vld [vmem:[%s902_s1 + $0x118] sm:$0xff]  }
   0xa   :  { %641 = vmatprep.subr.bf16.mxu1 %v692_v9  ;;  %v708_v25 = vld [vmem:[%s902_s1 + $0xc8] sm:$0xff]   ;;  %v712_v29 = vld [vmem:[%s902_s1 + $0xc0] sm:$0xff]   ;;  %v722_v37 = vld [vmem:[%s902_s1 + $0x110] sm:$0xff]  }
   0xb   :  { %v709_v26 = vld [vmem:[%s902_s1 + $0x8] sm:$0xff]   ;;  %v713_v30 = vld [vmem:[%s902_s1] sm:$0xff]  }
   0xc   :  { %614 = vmatpush3.bf16.msra.mxu0 %v693_v10  ;;  %v710_v27 = vld [vmem:[%s902_s1 + $0x88] sm:$0xff]   ;;  %v714_v31 = vld [vmem:[%s902_s1 + $0x80] sm:$0xff]  }
   0xd   :  { %642 = vmatpush3.bf16.msra.mxu1 %v694_v11  ;;  %615 = vmatprep.subr.bf16.mxu0 %v695_v12  ;;  %v715_v32 = vld [vmem:[%s903_s0] ss:$20 sps:$4 sm:$0xff]   ;;  %v717_v33 = vld [vmem:[%s903_s0 + $0x4] ss:$20 sps:$4 sm:$0xff]   ;;  %v718_v34 = vld [vmem:[%s903_s0 + $0x8] ss:$20 sps:$4 sm:$0xff]  }
   0xe   :  { %643 = vmatprep.subr.bf16.mxu1 %v696_v13  ;;  %v720_v35 = vld [vmem:[%s903_s0 + $0xc] ss:$20 sps:$4 sm:$0xff]   ;;  %401 = vmatprep.mubr.bf16.mxu0 %v717_v33  ;;  %v725_v39 = vld [vmem:[%s903_s0 + $0x34] ss:$20 sps:$4 sm:$0xff]   ;;  %v728_v42 = vld [vmem:[%s903_s0 + $0x30] ss:$20 sps:$4 sm:$0xff]  }
   0xf   :  { %450 = vmatprep.mubr.bf16.mxu1 %v720_v35  ;;  %v723_v38 = vld [vmem:[%s903_s0 + $0x2c] ss:$20 sps:$4 sm:$0xff]   ;;  %v727_v40 = vld [vmem:[%s903_s0 + $0x28] ss:$20 sps:$4 sm:$0xff]   ;;  %v731_v43 = vld [vmem:[%s903_s0 + $0x10] ss:$20 sps:$4 sm:$0xff]  }
  0x10   :  { %616 = vmatpush3.bf16.msra.mxu0 %v697_v14  ;;  %v729_v41 = vld [vmem:[%s902_s1 + $0x108] sm:$0xff]   ;;  %v730_v44 = vld [vmem:[%s902_s1 + $0x100] sm:$0xff]  }
  0x11   :  { %644 = vmatpush3.bf16.msra.mxu1 %v698_v15  ;;  %617 = vmatprep.subr.bf16.mxu0 %v699_v16  ;;  %v732_v45 = vld [vmem:[%s903_s0 + $0x38] ss:$20 sps:$4 sm:$0xff]  }
  0x12   :  { %645 = vmatprep.subr.bf16.mxu1 %v700_v17 }
  0x14   :  { %618 = vmatpush3.bf16.msra.mxu0 %v701_v18 }
  0x15   :  { %646 = vmatpush3.bf16.msra.mxu1 %v702_v19  ;;  %619 = vmatprep.subr.bf16.mxu0 %v703_v20 }
  0x16   :  { %647 = vmatprep.subr.bf16.mxu1 %v704_v21 }
  0x18   :  { %620 = vmatpush3.bf16.msra.mxu0 %v705_v22 }
  0x19   :  { %648 = vmatpush3.bf16.msra.mxu1 %v706_v23  ;;  %621 = vmatprep.subr.bf16.mxu0 %v707_v24 }
  0x1a   :  { %649 = vmatprep.subr.bf16.mxu1 %v708_v25 }
  0x1c   :  { %622 = vmatpush3.bf16.msra.mxu0 %v709_v26 }
  0x1d   :  { %650 = vmatpush3.bf16.msra.mxu1 %v710_v27  ;;  %623 = vmatprep.subr.bf16.mxu0 %v711_v28 }
  0x1e   :  { %651 = vmatprep.subr.bf16.mxu1 %v712_v29 }
  0x20   :  { %624 = vmatpush3.bf16.msra.mxu0 %v713_v30 }
  0x21   :  { %652 = vmatpush3.bf16.msra.mxu1 %v714_v31  ;;  %671 = vmatprep.subr.bf16.mxu0 %v721_v36 }
  0x23   :  { %402 = vmatmul.mubr.bf16.vlgmr.msra.gmra.mxu0 %v715_v32 }
  0x24   :  { %451 = vmatmul.mubr.bf16.vlgmr.msra.gmra.mxu1 %v718_v34  ;;  %672 = vmatpush3.bf16.msra.mxu0 %v721_v36 }
  0x25   :  { %673 = vmatprep.subr.bf16.mxu0 %v722_v37  ;;  %409 = vmatprep.mubr.bf16.mxu0 %v723_v38 }
  0x26   :  { %458 = vmatprep.mubr.bf16.mxu1 %v725_v39 }
  0x28   :  { %674 = vmatpush3.bf16.msra.mxu0 %v722_v37 }
  0x29   :  { %675 = vmatprep.subr.bf16.mxu0 %v729_v41 }
  0x2b   :  { %410 = vmatmul.mubr.bf16.gmra.mxu0 %v727_v40 }
  0x2c   :  { %459 = vmatmul.mubr.bf16.gmra.mxu1 %v728_v42  ;;  %679 = vmatprep.mubr.msk.bf16.mxu0 %vm362_vm0, %v731_v43 }
  0x2d   :  { %676 = vmatpush3.bf16.msra.mxu0 %v729_v41 }
  0x2e   :  { %677 = vmatprep.subr.bf16.mxu0 %v730_v44 }
  0x31   :  { %678 = vmatpush3.bf16.msra.mxu0 %v730_v44 }
  0x34   :  { %680 = vmatmul.mubr.msk.bf16.vlgmr.msra.gmra.mxu0 %vm362_vm0, %v732_v45 }
  0xe3   :  { %v625_v46 = vpop.f32.mrf.mxu0 }
  0xe4   :  { %v653_v47 = vpop.f32.mrf.mxu1 }
  0xe5   :  { %v626_v48 = vpop.f32.mrf.mxu0 }
  0xe6   :  { %v654_v49 = vpop.f32.mrf.mxu1  ;;  %v627_v62 = vadd.f32 %v626_v48, %v625_v46 }
  0xe7   :  { %v628_v50 = vpop.f32.mrf.mxu0  ;;  %v655_v63 = vadd.f32 %v654_v49, %v653_v47 }
  0xe8   :  { %v656_v51 = vpop.f32.mrf.mxu1 }
  0xe9   :  { %v629_v52 = vpop.f32.mrf.mxu0  ;;  %v453_v9 = vadd.f32 %v655_v63, %v627_v62 }
  0xea   :  { %v657_v53 = vpop.f32.mrf.mxu1  ;;  %v630_v5 = vadd.f32 %v629_v52, %v628_v50 }
  0xeb   :  { %v631_v54 = vpop.f32.mrf.mxu0  ;;  %v658_v6 = vadd.f32 %v657_v53, %v656_v51 }
  0xec   :  { %v659_v55 = vpop.f32.mrf.mxu1 }
  0xed   :  { %v632_v56 = vpop.f32.mrf.mxu0  ;;  %v456_v15 = vadd.f32 %v658_v6, %v630_v5 }
  0xee   :  { %v660_v57 = vpop.f32.mrf.mxu1  ;;  %v633_v58 = vadd.f32 %v632_v56, %v631_v54 }
  0xef   :  { %v661_v59 = vadd.f32 %v660_v57, %v659_v55  ;;  %v634_v60 = vpop.f32.mrf.mxu0 }
  0xf0   :  { %v662_v61 = vpop.f32.mrf.mxu1 }
  0xf1   :  { %v635_v0 = vpop.f32.mrf.mxu0  ;;  %v461_v4 = vadd.f32 %v661_v59, %v633_v58 }
  0xf2   :  { %v663_v1 = vpop.f32.mrf.mxu1  ;;  %v636_v2 = vadd.f32 %v635_v0, %v634_v60 }
  0xf3   :  { %v664_v3 = vadd.f32 %v663_v1, %v662_v61 }
  0xf4   :  { %v681_v7 = vpop.f32.mrf.mxu0 }
  0xf5   :  { %v510_v8 = vadd.f32 %v681_v7, %v461_v4  ;;  %v464_v13 = vadd.f32 %v664_v3, %v636_v2 }
  0xf6   :  { %v501_v10 = vpop.f32.mrf.mxu0 }
  0xf7   :  { %vm518_vm1 = vcmp.ge.f32.partialorder %v510_v8, 0.0  ;;  %v522_v11 = vmul.f32 0.2, %v510_v8  ;;  %v502_v12 = vadd.f32 %v501_v10, %v453_v9 }
  0xf8   :  { %v682_v14 = vpop.f32.mrf.mxu0 }
  0xf9   :  { %v526_v16 = vsel %vm518_vm1, %v510_v8, %v522_v11  ;;  %vm516_vm3 = vcmp.ge.f32.partialorder %v502_v12, 0.0  ;;  %v520_v17 = vmul.f32 0.2, %v502_v12  ;;  %v513_v18 = vadd.f32 %v682_v14, %v464_v13 }
  0xfa   :  { %v607_v19 = vpack.c.bf16 %v526_v16, %v526_v16  ;;  %v504_v20 = vpop.f32.mrf.mxu0 }
  0xfb   :  { %v524_v21 = vsel %vm516_vm3, %v502_v12, %v520_v17  ;;  %vm519_vm4 = vcmp.ge.f32.partialorder %v513_v18, 0.0  ;;  %v523_v22 = vmul.f32 0.2, %v513_v18  ;;  %v505_v23 = vadd.f32 %v504_v20, %v456_v15 }
  0xfc   :  { %547 = vst.msk [vmem:[%s904_s2 + $0x8] sm:$0xf] %vm544_vm2, %v607_v19  ;;  %v605_v24 = vpack.c.bf16 %v524_v21, %v524_v21 }
  0xfd   :  { %v527_v25 = vsel %vm519_vm4, %v513_v18, %v523_v22  ;;  %vm517_vm5 = vcmp.ge.f32.partialorder %v505_v23, 0.0  ;;  %v521_v26 = vmul.f32 0.2, %v505_v23 }
  0xfe   :  { %545 = vst.msk [vmem:[%s904_s2] sm:$0xf] %vm544_vm2, %v605_v24  ;;  %v608_v27 = vpack.c.bf16 %v527_v25, %v527_v25 }
  0xff   :  { %v525_v28 = vsel %vm517_vm5, %v505_v23, %v521_v26 }
 0x100   :  { %548 = vst.msk [vmem:[%s904_s2 + $0xc] sm:$0xf] %vm544_vm2, %v608_v27  ;;  %v606_v29 = vpack.c.bf16 %v525_v28, %v525_v28 }
 0x102   :  { %546 = vst.msk [vmem:[%s904_s2 + $0x4] sm:$0xf] %vm544_vm2, %v606_v29 }

// kernel: vae_forward.9
= control target key start
LH: loop header
LB: loop body
LE: loop exit
PB: predicated region body
PF: predicated region fallthrough
CT: control target
= control target key end

     0   :  { %vm129_vm0 = vcmask 1043456   ;;  %vm104_vm1 = vcmask 588800   ;;  %vm326_vm2 = vcmask 97280   ;;  %s638_s1 = inlined_call_operand.vmem [shape: bf16[72,12], index: 1, kind: input, shape index: {}]   ;;  %s639_s0 = inlined_call_operand.vmem [shape: bf16[128,72], index: 0, kind: input, shape index: {}]   ;;  %s640_s2 = inlined_call_operand.vmem [shape: f32[128,12], index: 2, kind: output, shape index: {}]  }
   0x1   :  { %v435_v0 = vld [vmem:[%s638_s1 + $0x20] ss:$0 sps:$4 sm:$0xff]   ;;  %v436_v1 = vld [vmem:[%s638_s1 + $0x18] sm:$0xff]   ;;  %v437_v3 = vld [vmem:[%s638_s1 + $0x10] sm:$0xff]  }
   0x2   :  { %433 = vmatprep.subr.msk.bf16.mxu0 %vm129_vm0, %v435_v0  ;;  %434 = vmatprep.subr.msk.bf16.mxu1 %vm129_vm0, %v435_v0  ;;  %v131_v2 = vsel %vm129_vm0, %v435_v0, 0  ;;  %v440_v4 = vld [vmem:[%s639_s0] sm:$0xff]   ;;  %v438_v6 = vld [vmem:[%s638_s1 + $0x8] sm:$0xff]   ;;  %v444_v10 = vld [vmem:[%s639_s0 + $0x10] sm:$0xff]  }
   0x3   :  { %398 = vmatpush3.bf16.msra.mxu0 %v131_v2  ;;  %428 = vmatpush3.bf16.msra.mxu1 %v131_v2  ;;  %v441_v5 = vld [vmem:[%s639_s0 + $0x20] sm:$0xff]   ;;  %v442_v8 = vld [vmem:[%s639_s0 + $0x8] sm:$0xff]   ;;  %v445_v11 = vld [vmem:[%s639_s0 + $0x30] sm:$0xff]  }
   0x4   :  { %399 = vmatprep.subr.bf16.mxu0 %v436_v1  ;;  %424 = vmatprep.subr.bf16.mxu1 %v436_v1  ;;  %v439_v7 = vld [vmem:[%s638_s1] sm:$0xff]   ;;  %v443_v9 = vld [vmem:[%s639_s0 + $0x28] sm:$0xff]   ;;  %v446_v12 = vld [vmem:[%s639_s0 + $0x18] sm:$0xff]  }
   0x5   :  { %407 = vmatprep.mubr.msk.bf16.mxu0 %vm104_vm1, %v440_v4  ;;  %415 = vmatprep.mubr.msk.bf16.mxu1 %vm104_vm1, %v441_v5  ;;  %v447_v13 = vld [vmem:[%s639_s0 + $0x38] sm:$0xff]  }
   0x7   :  { %400 = vmatpush3.bf16.msra.mxu0 %v436_v1  ;;  %429 = vmatpush3.bf16.msra.mxu1 %v436_v1 }
   0x8   :  { %401 = vmatprep.subr.bf16.mxu0 %v437_v3  ;;  %425 = vmatprep.subr.bf16.mxu1 %v437_v3 }
   0xb   :  { %402 = vmatpush3.bf16.msra.mxu0 %v437_v3  ;;  %430 = vmatpush3.bf16.msra.mxu1 %v437_v3 }
   0xc   :  { %403 = vmatprep.subr.bf16.mxu0 %v438_v6  ;;  %426 = vmatprep.subr.bf16.mxu1 %v438_v6 }
   0xf   :  { %404 = vmatpush3.bf16.msra.mxu0 %v438_v6  ;;  %431 = vmatpush3.bf16.msra.mxu1 %v438_v6 }
  0x10   :  { %405 = vmatprep.subr.bf16.mxu0 %v439_v7  ;;  %427 = vmatprep.subr.bf16.mxu1 %v439_v7 }
  0x13   :  { %406 = vmatpush3.bf16.msra.mxu0 %v439_v7  ;;  %432 = vmatpush3.bf16.msra.mxu1 %v439_v7 }
  0x16   :  { %408 = vmatmul.mubr.msk.bf16.vlgmr.msra.gmra.mxu0 %vm104_vm1, %v442_v8  ;;  %416 = vmatmul.mubr.msk.bf16.vlgmr.msra.gmra.mxu1 %vm104_vm1, %v443_v9 }
  0x17   :  { %411 = vmatprep.mubr.msk.bf16.mxu0 %vm104_vm1, %v444_v10  ;;  %419 = vmatprep.mubr.msk.bf16.mxu1 %vm104_vm1, %v445_v11 }
  0x1e   :  { %412 = vmatmul.mubr.msk.bf16.gmra.mxu0 %vm104_vm1, %v446_v12  ;;  %420 = vmatmul.mubr.msk.bf16.gmra.mxu1 %vm104_vm1, %v447_v13 }
  0xd6   :  { %v409_v14 = vpop.f32.mrf.mxu0  ;;  %v417_v15 = vpop.f32.mrf.mxu1 }
  0xd7   :  { %v370_v16 = vmul.f32 -1.442695, %v409_v14  ;;  %v378_v17 = vmul.f32 -1.442695, %v417_v15 }
  0xd8   :  { %v167_v18 = vpop.f32.mrf.mxu0  ;;  %v199_v19 = vpop.f32.mrf.mxu1 }
  0xd9   :  { %448 = vpow2.f32 %v370_v16  ;;  %v368_v20 = vmul.f32 -1.442695, %v167_v18  ;;  %v376_v21 = vmul.f32 -1.442695, %v199_v19 }
  0xda   :  { %450 = vpow2.f32 %v378_v17  ;;  %v410_v22 = vpop.f32.mrf.mxu0  ;;  %v418_v23 = vpop.f32.mrf.mxu1 }
  0xdb   :  { %452 = vpow2.f32 %v368_v20  ;;  %v371_v24 = vmul.f32 -1.442695, %v410_v22  ;;  %v379_v25 = vmul.f32 -1.442695, %v418_v23 }
  0xdc   :  { %454 = vpow2.f32 %v376_v21  ;;  %v170_v26 = vpop.f32.mrf.mxu0  ;;  %v202_v27 = vpop.f32.mrf.mxu1 }
  0xdd   :  { %456 = vpow2.f32 %v371_v24  ;;  %v369_v28 = vmul.f32 -1.442695, %v170_v26  ;;  %v377_v29 = vmul.f32 -1.442695, %v202_v27 }
  0xde   :  { %458 = vpow2.f32 %v379_v25  ;;  %v413_v30 = vpop.f32.mrf.mxu0  ;;  %v421_v31 = vpop.f32.mrf.mxu1 }
  0xdf   :  { %460 = vpow2.f32 %v369_v28  ;;  %v374_v32 = vmul.f32 -1.442695, %v413_v30  ;;  %v382_v33 = vmul.f32 -1.442695, %v421_v31 }
  0xe0   :  { %462 = vpow2.f32 %v377_v29  ;;  %v183_v34 = vpop.f32.mrf.mxu0  ;;  %v215_v35 = vpop.f32.mrf.mxu1 }
  0xe1   :  { %464 = vpow2.f32 %v374_v32  ;;  %v372_v36 = vmul.f32 -1.442695, %v183_v34  ;;  %v380_v37 = vmul.f32 -1.442695, %v215_v35 }
  0xe2   :  { %466 = vpow2.f32 %v382_v33  ;;  %v414_v38 = vpop.f32.mrf.mxu0  ;;  %v422_v39 = vpop.f32.mrf.mxu1 }
  0xe3   :  { %468 = vpow2.f32 %v372_v36  ;;  %v375_v40 = vmul.f32 -1.442695, %v414_v38  ;;  %v383_v41 = vmul.f32 -1.442695, %v422_v39 }
  0xe4   :  { %470 = vpow2.f32 %v380_v37  ;;  %v186_v42 = vpop.f32.mrf.mxu0  ;;  %v218_v43 = vpop.f32.mrf.mxu1 }
  0xe5   :  { %472 = vpow2.f32 %v375_v40  ;;  %v373_v44 = vmul.f32 -1.442695, %v186_v42  ;;  %v381_v45 = vmul.f32 -1.442695, %v218_v43 }
  0xe6   :  { %v449_v46 = vpop.eup %448  ;;  %474 = vpow2.f32 %v383_v41 }
  0xe7   :  { %v451_v47 = vpop.eup %450  ;;  %v280_v48 = vadd.f32 1.0, %v449_v46  ;;  %476 = vpow2.f32 %v373_v44 }
  0xe8   :  { %v453_v49 = vpop.eup %452  ;;  %v288_v50 = vadd.f32 1.0, %v451_v47  ;;  %478 = vpow2.f32 %v381_v45 }
  0xe9   :  { %v455_v51 = vpop.eup %454  ;;  %480 = vrcp.f32 %v280_v48  ;;  %v278_v52 = vadd.f32 1.0, %v453_v49 }
  0xea   :  { %v457_v53 = vpop.eup %456  ;;  %482 = vrcp.f32 %v288_v50  ;;  %v286_v54 = vadd.f32 1.0, %v455_v51 }
  0xeb   :  { %v459_v55 = vpop.eup %458  ;;  %484 = vrcp.f32 %v278_v52  ;;  %v281_v56 = vadd.f32 1.0, %v457_v53 }
  0xec   :  { %v461_v57 = vpop.eup %460  ;;  %486 = vrcp.f32 %v286_v54  ;;  %v289_v58 = vadd.f32 1.0, %v459_v55 }
  0xed   :  { %v463_v59 = vpop.eup %462  ;;  %488 = vrcp.f32 %v281_v56  ;;  %v279_v60 = vadd.f32 1.0, %v461_v57 }
  0xee   :  { %v465_v61 = vpop.eup %464  ;;  %490 = vrcp.f32 %v289_v58  ;;  %v287_v62 = vadd.f32 1.0, %v463_v59 }
  0xef   :  { %v467_v63 = vpop.eup %466  ;;  %492 = vrcp.f32 %v279_v60  ;;  %v284_v0 = vadd.f32 1.0, %v465_v61 }
  0xf0   :  { %v469_v1 = vpop.eup %468  ;;  %494 = vrcp.f32 %v287_v62  ;;  %v292_v2 = vadd.f32 1.0, %v467_v63 }
  0xf1   :  { %v471_v3 = vpop.eup %470  ;;  %496 = vrcp.f32 %v284_v0  ;;  %v282_v4 = vadd.f32 1.0, %v469_v1 }
  0xf2   :  { %v473_v5 = vpop.eup %472  ;;  %498 = vrcp.f32 %v292_v2  ;;  %v290_v6 = vadd.f32 1.0, %v471_v3 }
  0xf3   :  { %v475_v7 = vpop.eup %474  ;;  %500 = vrcp.f32 %v282_v4  ;;  %v285_v8 = vadd.f32 1.0, %v473_v5 }
  0xf4   :  { %v477_v9 = vpop.eup %476  ;;  %502 = vrcp.f32 %v290_v6  ;;  %v293_v10 = vadd.f32 1.0, %v475_v7 }
  0xf5   :  { %v479_v11 = vpop.eup %478  ;;  %504 = vrcp.f32 %v285_v8  ;;  %v283_v12 = vadd.f32 1.0, %v477_v9 }
  0xf6   :  { %v481_v13 = vpop.eup %480  ;;  %506 = vrcp.f32 %v293_v10  ;;  %v291_v14 = vadd.f32 1.0, %v479_v11 }
  0xf7   :  { %v483_v15 = vpop.eup %482  ;;  %329 = vst.msk [vmem:[%s640_s2 + $0x10] sm:$0xff] %vm326_vm2, %v481_v13  ;;  %508 = vrcp.f32 %v283_v12 }
  0xf8   :  { %v485_v16 = vpop.eup %484  ;;  %337 = vst.msk [vmem:[%s640_s2 + $0x50] sm:$0xff] %vm326_vm2, %v483_v15  ;;  %510 = vrcp.f32 %v291_v14 }
  0xf9   :  { %v487_v17 = vpop.eup %486  ;;  %327 = vst.msk [vmem:[%s640_s2] sm:$0xff] %vm326_vm2, %v485_v16 }
  0xfa   :  { %v489_v18 = vpop.eup %488  ;;  %335 = vst.msk [vmem:[%s640_s2 + $0x40] sm:$0xff] %vm326_vm2, %v487_v17 }
  0xfb   :  { %v491_v19 = vpop.eup %490  ;;  %330 = vst.msk [vmem:[%s640_s2 + $0x18] sm:$0xff] %vm326_vm2, %v489_v18 }
  0xfc   :  { %v493_v20 = vpop.eup %492  ;;  %338 = vst.msk [vmem:[%s640_s2 + $0x58] sm:$0xff] %vm326_vm2, %v491_v19 }
  0xfd   :  { %v495_v21 = vpop.eup %494  ;;  %328 = vst.msk [vmem:[%s640_s2 + $0x8] sm:$0xff] %vm326_vm2, %v493_v20 }
  0xfe   :  { %v497_v22 = vpop.eup %496  ;;  %336 = vst.msk [vmem:[%s640_s2 + $0x48] sm:$0xff] %vm326_vm2, %v495_v21 }
  0xff   :  { %v499_v23 = vpop.eup %498  ;;  %333 = vst.msk [vmem:[%s640_s2 + $0x30] sm:$0xff] %vm326_vm2, %v497_v22 }
 0x100   :  { %v501_v24 = vpop.eup %500  ;;  %341 = vst.msk [vmem:[%s640_s2 + $0x70] sm:$0xff] %vm326_vm2, %v499_v23 }
 0x101   :  { %v503_v25 = vpop.eup %502  ;;  %331 = vst.msk [vmem:[%s640_s2 + $0x20] sm:$0xff] %vm326_vm2, %v501_v24 }
 0x102   :  { %v505_v26 = vpop.eup %504  ;;  %339 = vst.msk [vmem:[%s640_s2 + $0x60] sm:$0xff] %vm326_vm2, %v503_v25 }
 0x103   :  { %v507_v27 = vpop.eup %506  ;;  %334 = vst.msk [vmem:[%s640_s2 + $0x38] sm:$0xff] %vm326_vm2, %v505_v26 }
 0x104   :  { %v509_v28 = vpop.eup %508  ;;  %342 = vst.msk [vmem:[%s640_s2 + $0x78] sm:$0xff] %vm326_vm2, %v507_v27 }
 0x105   :  { %v511_v29 = vpop.eup %510  ;;  %332 = vst.msk [vmem:[%s640_s2 + $0x28] sm:$0xff] %vm326_vm2, %v509_v28 }
 0x106   :  { %340 = vst.msk [vmem:[%s640_s2 + $0x68] sm:$0xff] %vm326_vm2, %v511_v29 }

</bundles_post_ra>
